<compile_context>
chip_gen: v5e
topology: v5e:2x2
jax: 0.10.0
libtpu: 0.0.40
codegen_flags: <defaults>
</compile_context>

<pallas_src>
import jax
import jax.numpy as jnp
from jax.experimental import pallas as pl
from jax.experimental.pallas import tpu as pltpu

N, C_IN, C_OUT, H, W = 2, 4, 8, 16, 16
S = H * W          # 256 spatial positions per image
L = N * S          # 512 lanes: both batch images laid side by side
EPS = 1e-5

assert (H & (H - 1)) == 0 and (W & (W - 1)) == 0    # row/col decode uses shifts/ands
_W_SHIFT = W.bit_length() - 1

# packed parameter slab: (2*C_OUT, P_COLS), output channels in sublanes
_KA = 40                          # conv1 (9*C_IN=36) padded to a sublane multiple
_KB = 9 * C_OUT                   # conv2 contraction depth = 72
_OFF_WA = 0                       # combined [conv3x3 #1 ; 1x1] block: (16, 40)
_OFF_WB = _OFF_WA + _KA           # conv3x3 #2 block: rows 0..7, (8, 72)
_OFF_BN = _OFF_WB + _KB           # folded BN: rows 0..7, [s1 b1 s2 b2 s3 b3]
P_ROWS = 2 * C_OUT                # 16
P_COLS = 128                      # lane-aligned slab width (_OFF_BN + 6 = 118 <= 128)

_HP = jax.lax.Precision.HIGHEST


def _us_residual_block_kernel(x_ref, p_ref, o_ref):
    # x_ref: (N, C_IN, S)   p_ref: (P_ROWS, P_COLS)   o_ref: (N, C_OUT, S)

    # Stack the batch images side by side along lanes -> (C_IN, L), channels in sublanes.
    x = jnp.concatenate([x_ref[n] for n in range(N)], axis=1)

    p = p_ref[...]                                               # (16, 128)
    w_a = p[:, _OFF_WA:_OFF_WA + _KA]                            # (16, 40)
    w_b = p[0:C_OUT, _OFF_WB:_OFF_WB + _KB]                      # (8, 72)
    bn = p[0:C_OUT, _OFF_BN:_OFF_BN + 6]                         # (8, 6)
    s1, b1 = bn[:, 0:1], bn[:, 1:2]
    s2, b2 = bn[:, 2:3], bn[:, 3:4]
    s3, b3 = bn[:, 4:5], bn[:, 5:6]

    # ---- hoisted per-lane boundary masks (shared by both 3x3 convs) ----
    lane = jax.lax.broadcasted_iota(jnp.int32, (1, L), 1)
    col = lane & (W - 1)
    row = (lane >> _W_SHIFT) & (H - 1)
    masks = {}                                                   # (dy,dx) -> (1,L) f32 or None
    for dy in (-1, 0, 1):
        for dx in (-1, 0, 1):
            conds = []
            if dy == -1: conds.append(row >= 1)
            if dy == 1:  conds.append(row <= H - 2)
            if dx == -1: conds.append(col >= 1)
            if dx == 1:  conds.append(col <= W - 2)
            if conds:
                v = conds[0]
                for c in conds[1:]:
                    v = jnp.logical_and(v, c)
                masks[(dy, dx)] = v.astype(jnp.float32)
            else:
                masks[(dy, dx)] = None

    def im2col(inp, c_in, k_rows):
        # inp: (c_in, L). Tap (dy,dx) = lane roll of the whole stacked tensor; the
        # f32 mask zeroes every position whose neighbor lies outside its own image
        # (this also kills cross-batch / wrap-around leakage, since image boundaries
        # coincide with row boundaries). Taps stack along sublanes -> (k_rows, L).
        parts = []
        for t in range(9):
            dy, dx = t // 3 - 1, t % 3 - 1
            off = dy * W + dx
            sh = pltpu.roll(inp, (-off) % L, axis=1) if off != 0 else inp
            m = masks[(dy, dx)]
            parts.append(sh if m is None else sh * m)
        if k_rows > 9 * c_in:
            parts.append(jnp.zeros((k_rows - 9 * c_in, L), jnp.float32))
        return jnp.concatenate(parts, axis=0)                    # (k_rows, L)

    # ---- conv3x3 #1 and the 1x1 upper branch in ONE MXU matmul ----
    taps1 = im2col(x, C_IN, _KA)                                 # (40, L)
    r = jnp.dot(w_a, taps1, preferred_element_type=jnp.float32,
                precision=_HP)                                   # (16, L)
    y = r[0:C_OUT, :]                                            # conv3x3 #1
    x_up = r[C_OUT:2 * C_OUT, :]                                 # 1x1 branch
    y = jnp.maximum(y * s1 + b1, 0.0)

    # ---- conv3x3 #2 ----
    taps2 = im2col(y, C_OUT, _KB)                                # (72, L)
    y = jnp.dot(w_b, taps2, preferred_element_type=jnp.float32,
                precision=_HP)                                   # (8, L)
    y = jnp.maximum(y * s2 + b2, 0.0)

    # ---- residual add + BN + ReLU ----
    z = jnp.maximum((x_up + y) * s3 + b3, 0.0)                   # (C_OUT, L)

    # unpack the two images back into (N, C_OUT, S) (256-lane dense stores)
    for n in range(N):
        o_ref[n] = z[:, n * S:(n + 1) * S]


def us_residual_block(x_nchw, packed_params):
    """x_nchw: (N, C_IN, H, W) float32 -> (N, C_OUT, H, W) float32."""
    x2 = x_nchw.reshape(N, C_IN, S)                              # pure reshape, no transpose
    flops = 2 * (P_ROWS * _KA + C_OUT * _KB) * L + 10 * C_OUT * L
    bytes_accessed = (N * C_IN * S + P_ROWS * P_COLS + N * C_OUT * S) * 4
    out = pl.pallas_call(
        _us_residual_block_kernel,
        out_shape=jax.ShapeDtypeStruct((N, C_OUT, S), jnp.float32),
        in_specs=[pl.BlockSpec(memory_space=pltpu.MemorySpace.VMEM),
                  pl.BlockSpec(memory_space=pltpu.MemorySpace.VMEM)],
        out_specs=pl.BlockSpec(memory_space=pltpu.MemorySpace.VMEM),
        cost_estimate=pl.CostEstimate(flops=flops, transcendentals=0,
                                      bytes_accessed=bytes_accessed),
    )(x2, packed_params)
    return out.reshape(N, C_OUT, H, W)
    # TODO(synk): when several DUCK-Net blocks are chained, fuse them into one
    # pallas_call (grid over blocks, dimension_semantics=("parallel",)) so the
    # activations stay resident in VMEM instead of round-tripping HBM per block.


def _fold_bn(gamma, beta, mean, var):
    scale = gamma / jnp.sqrt(var + EPS)
    shift = beta - mean * scale
    return scale, shift


def make_params(key):
    ks = jax.random.split(key, 6)
    # PyTorch-style OIHW conv weights
    w_up_oihw = 0.1 * jax.random.normal(ks[0], (C_OUT, C_IN, 1, 1), jnp.float32)
    w1_oihw = 0.1 * jax.random.normal(ks[1], (C_OUT, C_IN, 3, 3), jnp.float32)
    w2_oihw = 0.1 * jax.random.normal(ks[2], (C_OUT, C_OUT, 3, 3), jnp.float32)

    def bn_params(k):
        ka, kb, kc, kd = jax.random.split(k, 4)
        gamma = 1.0 + 0.1 * jax.random.normal(ka, (C_OUT,), jnp.float32)
        beta = 0.1 * jax.random.normal(kb, (C_OUT,), jnp.float32)
        mean = 0.1 * jax.random.normal(kc, (C_OUT,), jnp.float32)
        var = jax.random.uniform(kd, (C_OUT,), jnp.float32, 0.5, 1.5)
        return gamma, beta, mean, var

    s1, b1 = _fold_bn(*bn_params(ks[3]))
    s2, b2 = _fold_bn(*bn_params(ks[4]))
    s3, b3 = _fold_bn(*bn_params(ks[5]))

    # im2col weight columns: col = t*C_in + ci with t = (dy+1)*3 + (dx+1)
    w1_cols = jnp.transpose(w1_oihw, (0, 2, 3, 1)).reshape(C_OUT, 9 * C_IN)   # (8, 36)
    w2_cols = jnp.transpose(w2_oihw, (0, 2, 3, 1)).reshape(C_OUT, 9 * C_OUT)  # (8, 72)
    w_up_cols = w_up_oihw[:, :, 0, 0]                                         # (8, 4)

    # combined block A: rows 0..7 = conv1, rows 8..15 = 1x1 placed at the center tap
    w_a = jnp.zeros((P_ROWS, _KA), jnp.float32)
    w_a = w_a.at[0:C_OUT, 0:9 * C_IN].set(w1_cols)
    w_a = w_a.at[C_OUT:2 * C_OUT, 4 * C_IN:5 * C_IN].set(w_up_cols)

    bn_cols = jnp.stack([s1, b1, s2, b2, s3, b3], axis=1)                     # (8, 6)

    packed = jnp.zeros((P_ROWS, P_COLS), jnp.float32)
    packed = packed.at[:, _OFF_WA:_OFF_WA + _KA].set(w_a)
    packed = packed.at[0:C_OUT, _OFF_WB:_OFF_WB + _KB].set(w2_cols)
    packed = packed.at[0:C_OUT, _OFF_BN:_OFF_BN + 6].set(bn_cols)

    ref_params = (w_up_oihw, w1_oihw, s1, b1, w2_oihw, s2, b2, s3, b3)
    return packed, ref_params


def reference_forward(x_nchw, ref_params):
    """Pure-JAX reference of the PyTorch forward (eval-mode BN, ReLU)."""
    (w_up_oihw, w1_oihw, s1, b1, w2_oihw, s2, b2, s3, b3) = ref_params
    x = jnp.transpose(x_nchw, (0, 2, 3, 1))
    dn = ("NHWC", "HWIO", "NHWC")
    to_hwio = lambda w: jnp.transpose(w, (2, 3, 1, 0))

    x_up = jax.lax.conv_general_dilated(x, to_hwio(w_up_oihw), (1, 1), "SAME",
                                        dimension_numbers=dn, precision=_HP)
    y = jax.lax.conv_general_dilated(x, to_hwio(w1_oihw), (1, 1), "SAME",
                                     dimension_numbers=dn, precision=_HP)
    y = jnp.maximum(y * s1 + b1, 0.0)
    y = jax.lax.conv_general_dilated(y, to_hwio(w2_oihw), (1, 1), "SAME",
                                     dimension_numbers=dn, precision=_HP)
    y = jnp.maximum(y * s2 + b2, 0.0)
    z = jnp.maximum((x_up + y) * s3 + b3, 0.0)
    return jnp.transpose(z, (0, 3, 1, 2))


if __name__ == "__main__":
    key = jax.random.PRNGKey(0)
    k_x, k_p = jax.random.split(key)
    x = jax.random.normal(k_x, (N, C_IN, H, W), jnp.float32)   # PyTorch NCHW input

    packed, ref_params = make_params(k_p)

    out = jax.block_until_ready(us_residual_block(x, packed))
    ref = jax.block_until_ready(reference_forward(x, ref_params))

    assert out.shape == (N, C_OUT, H, W), out.shape
    assert jnp.all(jnp.isfinite(out))
    max_err = float(jnp.max(jnp.abs(out - ref)))
    assert jnp.allclose(out, ref, atol=1e-3, rtol=1e-3), max_err

    print("KERNEL_OK")
</pallas_src>

<mosaic_0001>
module attributes {stable_mosaic.version = 11 : i64} {
  func.func @_us_residual_block_kernel(%arg0: memref<2x4x256xf32, #tpu.memory_space<vmem>>, %arg1: memref<16x128xf32, #tpu.memory_space<vmem>>, %arg2: memref<2x8x256xf32, #tpu.memory_space<vmem>>) attributes {dimension_semantics = [], scalar_prefetch = 0 : i64, scratch_operands = 0 : i64, tpu.core_type = #tpu.core_type<tc>} {
    %c0 = arith.constant 0 : index
    %c0_0 = arith.constant 0 : index
    %c0_1 = arith.constant 0 : index
    %0 = vector.load %arg0[%c0, %c0_0, %c0_1] : memref<2x4x256xf32, #tpu.memory_space<vmem>>, vector<1x4x256xf32>
    %1 = vector.shape_cast %0 : vector<1x4x256xf32> to vector<4x256xf32>
    %c1 = arith.constant 1 : index
    %c0_2 = arith.constant 0 : index
    %c0_3 = arith.constant 0 : index
    %2 = vector.load %arg0[%c1, %c0_2, %c0_3] : memref<2x4x256xf32, #tpu.memory_space<vmem>>, vector<1x4x256xf32>
    %3 = vector.shape_cast %2 : vector<1x4x256xf32> to vector<4x256xf32>
    %4 = tpu.concatenate %1, %3 in 1 : vector<4x256xf32>, vector<4x256xf32> -> vector<4x512xf32>
    %c0_4 = arith.constant 0 : index
    %c0_5 = arith.constant 0 : index
    %5 = vector.load %arg1[%c0_4, %c0_5] : memref<16x128xf32, #tpu.memory_space<vmem>>, vector<16x128xf32>
    %6 = vector.extract_strided_slice %5 {offsets = [0, 0], sizes = [16, 40], strides = [1, 1]} : vector<16x128xf32> to vector<16x40xf32>
    %7 = vector.extract_strided_slice %5 {offsets = [0, 40], sizes = [8, 72], strides = [1, 1]} : vector<16x128xf32> to vector<8x72xf32>
    %8 = vector.extract_strided_slice %5 {offsets = [0, 112], sizes = [8, 6], strides = [1, 1]} : vector<16x128xf32> to vector<8x6xf32>
    %9 = vector.extract_strided_slice %8 {offsets = [0, 0], sizes = [8, 1], strides = [1, 1]} : vector<8x6xf32> to vector<8x1xf32>
    %10 = vector.extract_strided_slice %8 {offsets = [0, 1], sizes = [8, 1], strides = [1, 1]} : vector<8x6xf32> to vector<8x1xf32>
    %11 = vector.extract_strided_slice %8 {offsets = [0, 2], sizes = [8, 1], strides = [1, 1]} : vector<8x6xf32> to vector<8x1xf32>
    %12 = vector.extract_strided_slice %8 {offsets = [0, 3], sizes = [8, 1], strides = [1, 1]} : vector<8x6xf32> to vector<8x1xf32>
    %13 = vector.extract_strided_slice %8 {offsets = [0, 4], sizes = [8, 1], strides = [1, 1]} : vector<8x6xf32> to vector<8x1xf32>
    %14 = vector.extract_strided_slice %8 {offsets = [0, 5], sizes = [8, 1], strides = [1, 1]} : vector<8x6xf32> to vector<8x1xf32>
    %15 = tpu.iota {dimensions = array<i32: 1>} : vector<1x512xi32>
    %c15_i32 = arith.constant 15 : i32
    %16 = vector.broadcast %c15_i32 : i32 to vector<1x512xi32>
    %17 = arith.andi %15, %16 : vector<1x512xi32>
    %c4_i32 = arith.constant 4 : i32
    %18 = vector.broadcast %c4_i32 : i32 to vector<1x512xi32>
    %19 = arith.shrsi %15, %18 : vector<1x512xi32>
    %c15_i32_6 = arith.constant 15 : i32
    %20 = vector.broadcast %c15_i32_6 : i32 to vector<1x512xi32>
    %21 = arith.andi %19, %20 : vector<1x512xi32>
    %c1_i32 = arith.constant 1 : i32
    %22 = vector.broadcast %c1_i32 : i32 to vector<1x512xi32>
    %23 = arith.cmpi sge, %21, %22 : vector<1x512xi32>
    %c1_i32_7 = arith.constant 1 : i32
    %24 = vector.broadcast %c1_i32_7 : i32 to vector<1x512xi32>
    %25 = arith.cmpi sge, %17, %24 : vector<1x512xi32>
    %26 = arith.andi %23, %25 : vector<1x512xi1>
    %27 = arith.extui %26 : vector<1x512xi1> to vector<1x512xi32>
    %28 = arith.sitofp %27 : vector<1x512xi32> to vector<1x512xf32>
    %c1_i32_8 = arith.constant 1 : i32
    %29 = vector.broadcast %c1_i32_8 : i32 to vector<1x512xi32>
    %30 = arith.cmpi sge, %21, %29 : vector<1x512xi32>
    %31 = arith.extui %30 : vector<1x512xi1> to vector<1x512xi32>
    %32 = arith.sitofp %31 : vector<1x512xi32> to vector<1x512xf32>
    %c1_i32_9 = arith.constant 1 : i32
    %33 = vector.broadcast %c1_i32_9 : i32 to vector<1x512xi32>
    %34 = arith.cmpi sge, %21, %33 : vector<1x512xi32>
    %c14_i32 = arith.constant 14 : i32
    %35 = vector.broadcast %c14_i32 : i32 to vector<1x512xi32>
    %36 = arith.cmpi sle, %17, %35 : vector<1x512xi32>
    %37 = arith.andi %34, %36 : vector<1x512xi1>
    %38 = arith.extui %37 : vector<1x512xi1> to vector<1x512xi32>
    %39 = arith.sitofp %38 : vector<1x512xi32> to vector<1x512xf32>
    %c1_i32_10 = arith.constant 1 : i32
    %40 = vector.broadcast %c1_i32_10 : i32 to vector<1x512xi32>
    %41 = arith.cmpi sge, %17, %40 : vector<1x512xi32>
    %42 = arith.extui %41 : vector<1x512xi1> to vector<1x512xi32>
    %43 = arith.sitofp %42 : vector<1x512xi32> to vector<1x512xf32>
    %c14_i32_11 = arith.constant 14 : i32
    %44 = vector.broadcast %c14_i32_11 : i32 to vector<1x512xi32>
    %45 = arith.cmpi sle, %17, %44 : vector<1x512xi32>
    %46 = arith.extui %45 : vector<1x512xi1> to vector<1x512xi32>
    %47 = arith.sitofp %46 : vector<1x512xi32> to vector<1x512xf32>
    %c14_i32_12 = arith.constant 14 : i32
    %48 = vector.broadcast %c14_i32_12 : i32 to vector<1x512xi32>
    %49 = arith.cmpi sle, %21, %48 : vector<1x512xi32>
    %c1_i32_13 = arith.constant 1 : i32
    %50 = vector.broadcast %c1_i32_13 : i32 to vector<1x512xi32>
    %51 = arith.cmpi sge, %17, %50 : vector<1x512xi32>
    %52 = arith.andi %49, %51 : vector<1x512xi1>
    %53 = arith.extui %52 : vector<1x512xi1> to vector<1x512xi32>
    %54 = arith.sitofp %53 : vector<1x512xi32> to vector<1x512xf32>
    %c14_i32_14 = arith.constant 14 : i32
    %55 = vector.broadcast %c14_i32_14 : i32 to vector<1x512xi32>
    %56 = arith.cmpi sle, %21, %55 : vector<1x512xi32>
    %57 = arith.extui %56 : vector<1x512xi1> to vector<1x512xi32>
    %58 = arith.sitofp %57 : vector<1x512xi32> to vector<1x512xf32>
    %c14_i32_15 = arith.constant 14 : i32
    %59 = vector.broadcast %c14_i32_15 : i32 to vector<1x512xi32>
    %60 = arith.cmpi sle, %21, %59 : vector<1x512xi32>
    %c14_i32_16 = arith.constant 14 : i32
    %61 = vector.broadcast %c14_i32_16 : i32 to vector<1x512xi32>
    %62 = arith.cmpi sle, %17, %61 : vector<1x512xi32>
    %63 = arith.andi %60, %62 : vector<1x512xi1>
    %64 = arith.extui %63 : vector<1x512xi1> to vector<1x512xi32>
    %65 = arith.sitofp %64 : vector<1x512xi32> to vector<1x512xf32>
    %c17_i32 = arith.constant 17 : i32
    %66 = tpu.dynamic_rotate %4 by %c17_i32 dim 1 : vector<4x512xf32>, i32 -> vector<4x512xf32>
    %67 = vector.broadcast %28 : vector<1x512xf32> to vector<4x512xf32>
    %68 = arith.mulf %66, %67 : vector<4x512xf32>
    %c16_i32 = arith.constant 16 : i32
    %69 = tpu.dynamic_rotate %4 by %c16_i32 dim 1 : vector<4x512xf32>, i32 -> vector<4x512xf32>
    %70 = vector.broadcast %32 : vector<1x512xf32> to vector<4x512xf32>
    %71 = arith.mulf %69, %70 : vector<4x512xf32>
    %c15_i32_17 = arith.constant 15 : i32
    %72 = tpu.dynamic_rotate %4 by %c15_i32_17 dim 1 : vector<4x512xf32>, i32 -> vector<4x512xf32>
    %73 = vector.broadcast %39 : vector<1x512xf32> to vector<4x512xf32>
    %74 = arith.mulf %72, %73 : vector<4x512xf32>
    %c1_i32_18 = arith.constant 1 : i32
    %75 = tpu.dynamic_rotate %4 by %c1_i32_18 dim 1 : vector<4x512xf32>, i32 -> vector<4x512xf32>
    %76 = vector.broadcast %43 : vector<1x512xf32> to vector<4x512xf32>
    %77 = arith.mulf %75, %76 : vector<4x512xf32>
    %c511_i32 = arith.constant 511 : i32
    %78 = tpu.dynamic_rotate %4 by %c511_i32 dim 1 : vector<4x512xf32>, i32 -> vector<4x512xf32>
    %79 = vector.broadcast %47 : vector<1x512xf32> to vector<4x512xf32>
    %80 = arith.mulf %78, %79 : vector<4x512xf32>
    %c497_i32 = arith.constant 497 : i32
    %81 = tpu.dynamic_rotate %4 by %c497_i32 dim 1 : vector<4x512xf32>, i32 -> vector<4x512xf32>
    %82 = vector.broadcast %54 : vector<1x512xf32> to vector<4x512xf32>
    %83 = arith.mulf %81, %82 : vector<4x512xf32>
    %c496_i32 = arith.constant 496 : i32
    %84 = tpu.dynamic_rotate %4 by %c496_i32 dim 1 : vector<4x512xf32>, i32 -> vector<4x512xf32>
    %85 = vector.broadcast %58 : vector<1x512xf32> to vector<4x512xf32>
    %86 = arith.mulf %84, %85 : vector<4x512xf32>
    %c495_i32 = arith.constant 495 : i32
    %87 = tpu.dynamic_rotate %4 by %c495_i32 dim 1 : vector<4x512xf32>, i32 -> vector<4x512xf32>
    %88 = vector.broadcast %65 : vector<1x512xf32> to vector<4x512xf32>
    %89 = arith.mulf %87, %88 : vector<4x512xf32>
    %cst = arith.constant 0.000000e+00 : f32
    %90 = vector.broadcast %cst : f32 to vector<4x512xf32>
    %91 = tpu.concatenate %68, %71, %74, %77, %4, %80, %83, %86, %89, %90 in 0 : vector<4x512xf32>, vector<4x512xf32>, vector<4x512xf32>, vector<4x512xf32>, vector<4x512xf32>, vector<4x512xf32>, vector<4x512xf32>, vector<4x512xf32>, vector<4x512xf32>, vector<4x512xf32> -> vector<40x512xf32>
    %cst_19 = arith.constant dense<0.000000e+00> : vector<16x512xf32>
    %92 = tpu.matmul %6, %91, %cst_19 {dimension_numbers = #tpu.dot_dimension_numbers<[1], [0], [0], [1], [0, 0, 1, 1], [], []>, precision = #tpu.contract_precision<fp32>} : vector<16x40xf32>, vector<40x512xf32>, vector<16x512xf32> -> vector<16x512xf32>
    %93 = vector.extract_strided_slice %92 {offsets = [0, 0], sizes = [8, 512], strides = [1, 1]} : vector<16x512xf32> to vector<8x512xf32>
    %94 = vector.extract_strided_slice %92 {offsets = [8, 0], sizes = [8, 512], strides = [1, 1]} : vector<16x512xf32> to vector<8x512xf32>
    %95 = vector.broadcast %9 : vector<8x1xf32> to vector<8x512xf32>
    %96 = arith.mulf %93, %95 : vector<8x512xf32>
    %97 = vector.broadcast %10 : vector<8x1xf32> to vector<8x512xf32>
    %98 = arith.addf %96, %97 : vector<8x512xf32>
    %cst_20 = arith.constant 0.000000e+00 : f32
    %99 = vector.broadcast %cst_20 : f32 to vector<8x512xf32>
    %100 = arith.maximumf %98, %99 : vector<8x512xf32>
    %c17_i32_21 = arith.constant 17 : i32
    %101 = tpu.dynamic_rotate %100 by %c17_i32_21 dim 1 : vector<8x512xf32>, i32 -> vector<8x512xf32>
    %102 = vector.broadcast %28 : vector<1x512xf32> to vector<8x512xf32>
    %103 = arith.mulf %101, %102 : vector<8x512xf32>
    %c16_i32_22 = arith.constant 16 : i32
    %104 = tpu.dynamic_rotate %100 by %c16_i32_22 dim 1 : vector<8x512xf32>, i32 -> vector<8x512xf32>
    %105 = vector.broadcast %32 : vector<1x512xf32> to vector<8x512xf32>
    %106 = arith.mulf %104, %105 : vector<8x512xf32>
    %c15_i32_23 = arith.constant 15 : i32
    %107 = tpu.dynamic_rotate %100 by %c15_i32_23 dim 1 : vector<8x512xf32>, i32 -> vector<8x512xf32>
    %108 = vector.broadcast %39 : vector<1x512xf32> to vector<8x512xf32>
    %109 = arith.mulf %107, %108 : vector<8x512xf32>
    %c1_i32_24 = arith.constant 1 : i32
    %110 = tpu.dynamic_rotate %100 by %c1_i32_24 dim 1 : vector<8x512xf32>, i32 -> vector<8x512xf32>
    %111 = vector.broadcast %43 : vector<1x512xf32> to vector<8x512xf32>
    %112 = arith.mulf %110, %111 : vector<8x512xf32>
    %c511_i32_25 = arith.constant 511 : i32
    %113 = tpu.dynamic_rotate %100 by %c511_i32_25 dim 1 : vector<8x512xf32>, i32 -> vector<8x512xf32>
    %114 = vector.broadcast %47 : vector<1x512xf32> to vector<8x512xf32>
    %115 = arith.mulf %113, %114 : vector<8x512xf32>
    %c497_i32_26 = arith.constant 497 : i32
    %116 = tpu.dynamic_rotate %100 by %c497_i32_26 dim 1 : vector<8x512xf32>, i32 -> vector<8x512xf32>
    %117 = vector.broadcast %54 : vector<1x512xf32> to vector<8x512xf32>
    %118 = arith.mulf %116, %117 : vector<8x512xf32>
    %c496_i32_27 = arith.constant 496 : i32
    %119 = tpu.dynamic_rotate %100 by %c496_i32_27 dim 1 : vector<8x512xf32>, i32 -> vector<8x512xf32>
    %120 = vector.broadcast %58 : vector<1x512xf32> to vector<8x512xf32>
    %121 = arith.mulf %119, %120 : vector<8x512xf32>
    %c495_i32_28 = arith.constant 495 : i32
    %122 = tpu.dynamic_rotate %100 by %c495_i32_28 dim 1 : vector<8x512xf32>, i32 -> vector<8x512xf32>
    %123 = vector.broadcast %65 : vector<1x512xf32> to vector<8x512xf32>
    %124 = arith.mulf %122, %123 : vector<8x512xf32>
    %125 = tpu.concatenate %103, %106, %109, %112, %100, %115, %118, %121, %124 in 0 : vector<8x512xf32>, vector<8x512xf32>, vector<8x512xf32>, vector<8x512xf32>, vector<8x512xf32>, vector<8x512xf32>, vector<8x512xf32>, vector<8x512xf32>, vector<8x512xf32> -> vector<72x512xf32>
    %cst_29 = arith.constant dense<0.000000e+00> : vector<8x512xf32>
    %126 = tpu.matmul %7, %125, %cst_29 {dimension_numbers = #tpu.dot_dimension_numbers<[1], [0], [0], [1], [0, 0, 1, 1], [], []>, precision = #tpu.contract_precision<fp32>} : vector<8x72xf32>, vector<72x512xf32>, vector<8x512xf32> -> vector<8x512xf32>
    %127 = vector.broadcast %11 : vector<8x1xf32> to vector<8x512xf32>
    %128 = arith.mulf %126, %127 : vector<8x512xf32>
    %129 = vector.broadcast %12 : vector<8x1xf32> to vector<8x512xf32>
    %130 = arith.addf %128, %129 : vector<8x512xf32>
    %cst_30 = arith.constant 0.000000e+00 : f32
    %131 = vector.broadcast %cst_30 : f32 to vector<8x512xf32>
    %132 = arith.maximumf %130, %131 : vector<8x512xf32>
    %133 = arith.addf %94, %132 : vector<8x512xf32>
    %134 = vector.broadcast %13 : vector<8x1xf32> to vector<8x512xf32>
    %135 = arith.mulf %133, %134 : vector<8x512xf32>
    %136 = vector.broadcast %14 : vector<8x1xf32> to vector<8x512xf32>
    %137 = arith.addf %135, %136 : vector<8x512xf32>
    %cst_31 = arith.constant 0.000000e+00 : f32
    %138 = vector.broadcast %cst_31 : f32 to vector<8x512xf32>
    %139 = arith.maximumf %137, %138 : vector<8x512xf32>
    %140 = vector.extract_strided_slice %139 {offsets = [0, 0], sizes = [8, 256], strides = [1, 1]} : vector<8x512xf32> to vector<8x256xf32>
    %c0_32 = arith.constant 0 : index
    %c0_33 = arith.constant 0 : index
    %c0_34 = arith.constant 0 : index
    %141 = vector.load %arg2[%c0_32, %c0_33, %c0_34] : memref<2x8x256xf32, #tpu.memory_space<vmem>>, vector<1x8x256xf32>
    %142 = vector.shape_cast %141 : vector<1x8x256xf32> to vector<8x256xf32>
    %143 = vector.shape_cast %140 : vector<8x256xf32> to vector<1x8x256xf32>
    tpu.vector_store %arg2[%c0_32, %c0_33, %c0_34], %143 {strides = array<i32>} : memref<2x8x256xf32, #tpu.memory_space<vmem>>, vector<1x8x256xf32>,
    %144 = vector.extract_strided_slice %139 {offsets = [0, 256], sizes = [8, 256], strides = [1, 1]} : vector<8x512xf32> to vector<8x256xf32>
    %c1_35 = arith.constant 1 : index
    %c0_36 = arith.constant 0 : index
    %c0_37 = arith.constant 0 : index
    %145 = vector.load %arg2[%c1_35, %c0_36, %c0_37] : memref<2x8x256xf32, #tpu.memory_space<vmem>>, vector<1x8x256xf32>
    %146 = vector.shape_cast %145 : vector<1x8x256xf32> to vector<8x256xf32>
    %147 = vector.shape_cast %144 : vector<8x256xf32> to vector<1x8x256xf32>
    tpu.vector_store %arg2[%c1_35, %c0_36, %c0_37], %147 {strides = array<i32>} : memref<2x8x256xf32, #tpu.memory_space<vmem>>, vector<1x8x256xf32>,
    return
  }
}

</mosaic_0001>

<bundles_post_ra>
// kernel: tpu_custom_call.1
= control target key start
LH: loop header
LB: loop body
LE: loop exit
PB: predicated region body
PF: predicated region fallthrough
CT: control target
= control target key end

     0   :  { %7 = vsyncpa [#allocation3], 0  ;;  %s4564_s0 = inlined_call_operand.hbm [shape: f32[2,4,256], index: 0, kind: input, shape index: {}]   ;;  %s4565_s1 = inlined_call_operand.hbm [shape: f32[16,128], index: 1, kind: input, shape index: {}]   ;;  %s4566_s2 = inlined_call_operand.hbm [shape: f32[2,8,256], index: 2, kind: output, shape index: {}]  }
   0x1   :  { %8 = vsyncpa [#allocation6], 0 }
   0x2   :  { %9 = vsyncpa [#allocation4], 0  ;;  %s14_s11 = sshll.u32 %s4564_s0, 4  ;;  %s2665_s12 = smov [#allocation2]   ;;  %s15_s11 = int_to_ptr.hbm [resolvable:$true] %s14_s11 }
   0x3   :  { %s16_s13 = sshll.u32 %s2665_s12, 4  ;;  %s27_s16 = sshll.u32 %s4565_s1, 4  ;;  %s17_s13 = int_to_ptr.vmem [resolvable:$true] %s16_s13  ;;  %s28_s16 = int_to_ptr.hbm [resolvable:$true] %s27_s16 }
   0x4   :  { %s2666_s17 = smov 128   ;;  %s2667_s18 = smov 8  }
   0x5   :  { %22 = dma.hbm_to_vmem [thread:$0]  %s15_s11, 256, %s17_s13, [#allocation3], %s2666_s17, %s2666_s17, %s2667_s18  }
   0x6   :  { %s2668_s19 = smov [#allocation5]  }
   0x7   :  { %s29_s20 = sshll.u32 %s2668_s19, 4  ;;  %s30_s20 = int_to_ptr.vmem [resolvable:$true] %s29_s20 }
   0x8   :  { %35 = dma.hbm_to_vmem [thread:$0]  %s28_s16, 256, %s30_s20, [#allocation6], %s2666_s17, %s2666_s17, %s2667_s18  }
   0x9   :  { %2659 = dma.done.wait [#allocation3], 256  }
   0xa   :  { %2660 = vsyncadd [#allocation3], 4294967040 }
   0xb   :  { %2661 = dma.done.wait [#allocation6], 256  }
   0xc   :  { %2662 = vsyncadd [#allocation6], 4294967040  ;;  %v44_v0 = vld [vmem:[#allocation2] sm:$0xff]  ;;  %v46_v1 = vld [vmem:[#allocation2 + $0x8] sm:$0xff]  ;;  %s2669_s0 = smov 127   ;;  %s2670_s1 = smov 111   ;;  %v61_v8 = vlaneseq }
   0xd   :  { %48 = vst [vmem:[#allocation1] ss:$2 sm:$0xff] %v44_v0  ;;  %s2671_s21 = smov 112   ;;  %s2672_s22 = smov 1   ;;  %v4570_v18 = vmov 0.0   ;;  %vm358_vm6 = vcmask 1043456  }
   0xe   :  { %s2673_s23 = smov 113   ;;  %s2674_s24 = smov 16   ;;  %v2784_v9 = vand.u32 127, %v61_v8  ;;  %v2911_v58 = vld [vmem:[#allocation5] sm:$0xff]  ;;  %vm379_vm13 = vcmask 326656  }
   0xf   :  { %s2675_s25 = smov 15   ;;  %s2676_s26 = smov 17   ;;  %4639 = vst [vmem:[#allocation17_spill] sm:$0xff] %v2911_v58 }
  0x10   :  { %v70_v11 = vshra.s32 %v2784_v9, 4  ;;  %v66_v12 = vand.u32 15, %v2784_v9  ;;  %vm4590_vm1 = vcmp.lt.s32.totalorder %v2784_v9, 127  ;;  %v2818_v21 = vadd.s32 128, %v2784_v9  ;;  %s2680_s27 = smov 88   ;;  %s2685_s28 = smov [#allocation7]  }
  0x11   :  { %vm301_vm4 = vcmp.lt.s32.totalorder %v2784_v9, 111  ;;  %vm284_vm5 = vcmp.lt.s32.totalorder %v2784_v9, 112  ;;  %vm267_vm9 = vcmp.lt.s32.totalorder %v2784_v9, 113  ;;  %vm233_vm14 = vcmp.lt.s32.totalorder %v2784_v9, 1  ;;  %s2508_s29 = sshll.u32 %s2685_s28, 4  ;;  %s2510_s4 = sshll.u32 %s4566_s2, 4  ;;  %s2509_s29 = int_to_ptr.vmem [resolvable:$true] %s2508_s29  ;;  %s2511_s4 = int_to_ptr.hbm [resolvable:$true] %s2510_s4 }
  0x12   :  { %v2790_v13 = vand.u32 15, %v70_v11  ;;  %vm2792_vm0 = vcmp.le.s32.totalorder %v66_v12, 14  ;;  %v71_v25 = vshra.s32 %v2818_v21, 4  ;;  %vm2835_vm7 = vcmp.ge.s32.totalorder %v66_v12, 1  ;;  %s2686_s5 = smov 256  }
  0x13   :  { %v2807_v19 = vsel %vm2792_vm0, 1.0, %v4570_v18  ;;  %v67_v35 = vand.u32 15, %v2818_v21 }
  0x14   :  { %v2708_v2 = vld.sshfl [vmem:[#allocation1] sm:$0xff pattern:$0x75316420]  ;;  %v2710_v3 = vld.sshfl [vmem:[#allocation1 + $0x8] sm:$0xff pattern:$0x75316420] }
  0x15   :  { %242 = vrot.lane.b32.xlu2 %v2708_v2, %s2669_s0  ;;  %293 = vrot.lane.b32.xlu1 %v2708_v2, %s2670_s1  ;;  %54 = vst [vmem:[#allocation1] ss:$2 sm:$0xff] %v46_v1  ;;  %vm138_vm2 = vcmp.le.s32.totalorder %v2790_v13, 14  ;;  %v2850_v36 = vand.u32 15, %v71_v25  ;;  %vm2874_vm10 = vcmp.le.s32.totalorder %v67_v35, 14  ;;  %v381_v1 = vsel %vm379_vm13, %v2911_v58, 0 }
  0x16   :  { %276 = vrot.lane.b32.xlu0 %v2708_v2, %s2671_s21  ;;  %4629 = vst [vmem:[#allocation11_spill] sm:$0xff] %v2807_v19  ;;  %vm162_vm3 = vmand %vm138_vm2, %vm2792_vm0  ;;  %v2842_v32 = vsel %vm138_vm2, 1.0, %v4570_v18  ;;  %vm78_vm15 = vcmp.ge.s32.totalorder %v2790_v13, 1 }
  0x17   :  { %v2823_v23 = vsel %vm162_vm3, 1.0, %v4570_v18  ;;  %4633 = vst [vmem:[#allocation13_spill] sm:$0xff] %v2842_v32  ;;  %vm142_vm8 = vmand %vm138_vm2, %vm2835_vm7  ;;  %vm139_vm11 = vcmp.le.s32.totalorder %v2850_v36, 14  ;;  %vm4591_vm3 = vcmp.lt.s32.totalorder %v2784_v9, 15 }
  0x18   :  { %4630 = vst [vmem:[#allocation12_spill] sm:$0xff] %v2823_v23  ;;  %v2870_v42 = vsel %vm142_vm8, 1.0, %v4570_v18  ;;  %vm163_vm12 = vmand %vm139_vm11, %vm2874_vm10  ;;  %v3047_v21 = vsel %vm139_vm11, 1.0, %v4570_v18 }
  0x19   :  { %4634 = vst [vmem:[#allocation14_spill] sm:$0xff] %v2870_v42  ;;  %v2904_v55 = vsel %vm163_vm12, 1.0, %v4570_v18  ;;  %vm110_vm2 = vmand %vm78_vm15, %vm2792_vm0  ;;  %vm199_vm0 = vcmp.lt.s32.totalorder %v2784_v9, 16  ;;  %vm3032_vm12 = vcmp.ge.s32.totalorder %v67_v35, 1 }
  0x1a   :  { %4638 = vst [vmem:[#allocation16_spill] sm:$0xff] %v2904_v55  ;;  %v2964_v14 = vsel %vm110_vm2, 1.0, %v4570_v18  ;;  %vm86_vm8 = vmand %vm78_vm15, %vm2835_vm7  ;;  %vm79_vm2 = vcmp.ge.s32.totalorder %v2850_v36, 1 }
  0x1b   :  { %4644 = vst [vmem:[#allocation22_spill] sm:$0xff] %v2964_v14  ;;  %v3014_v13 = vsel %vm86_vm8, 1.0, %v4570_v18  ;;  %vm111_vm8 = vmand %vm79_vm2, %vm2874_vm10 }
  0x1c   :  { %v2730_v4 = vld.sshfl [vmem:[#allocation1 + $0x8] sm:$0xff pattern:$0x75316420]  ;;  %v2744_v5 = vld.sshfl [vmem:[#allocation1] sm:$0xff pattern:$0x75316420] }
  0x1d   :  { %244 = vrot.lane.b32.xlu2 %v2710_v3, %s2669_s0  ;;  %295 = vrot.lane.b32.xlu1 %v2710_v3, %s2670_s1  ;;  %4646 = vst [vmem:[#allocation24_spill] sm:$0xff] %v3014_v13 }
  0x1e   :  { %278 = vrot.lane.b32.xlu0 %v2710_v3, %s2671_s21  ;;  %4650 = vst [vmem:[#allocation26_spill] sm:$0xff] %v3047_v21 }
  0x25   :  { %225 = vrot.lane.b32.xlu2 %v2708_v2, %s2672_s22  ;;  %261 = vrot.lane.b32.xlu1 %v2710_v3, %s2673_s23 }
  0x26   :  { %259 = vrot.lane.b32.xlu0 %v2708_v2, %s2673_s23 }
  0x2d   :  { %191 = vrot.lane.b32.xlu1 %v2708_v2, %s2674_s24  ;;  %197 = vrot.lane.b32.xlu2 %v2730_v4, %s2674_s24 }
  0x2e   :  { %231 = vrot.lane.b32.xlu0 %v2730_v4, %s2672_s22 }
  0x35   :  { %214 = vrot.lane.b32.xlu1 %v2730_v4, %s2675_s25  ;;  %174 = vrot.lane.b32.xlu2 %v2708_v2, %s2676_s26 }
  0x36   :  { %208 = vrot.lane.b32.xlu0 %v2708_v2, %s2675_s25 }
  0x3d   :  { %297 = vrot.lane.b32.xlu2 %v2744_v5, %s2670_s1  ;;  %280 = vrot.lane.b32.xlu1 %v2744_v5, %s2671_s21 }
  0x3e   :  { %180 = vrot.lane.b32.xlu0 %v2730_v4, %s2676_s26 }
  0x45   :  { %227 = vrot.lane.b32.xlu2 %v2710_v3, %s2672_s22  ;;  %263 = vrot.lane.b32.xlu1 %v2744_v5, %s2673_s23 }
  0x46   :  { %246 = vrot.lane.b32.xlu0 %v2744_v5, %s2669_s0 }
  0x4d   :  { %176 = vrot.lane.b32.xlu2 %v2710_v3, %s2676_s26  ;;  %210 = vrot.lane.b32.xlu1 %v2710_v3, %s2675_s25 }
  0x4e   :  { %193 = vrot.lane.b32.xlu0 %v2710_v3, %s2674_s24 }
  0x55   :  { %248 = vrot.lane.b32.xlu2 %v2730_v4, %s2669_s0  ;;  %299 = vrot.lane.b32.xlu1 %v2730_v4, %s2670_s1 }
  0x56   :  { %282 = vrot.lane.b32.xlu0 %v2730_v4, %s2671_s21 }
  0x5d   :  { %195 = vrot.lane.b32.xlu2 %v2744_v5, %s2674_s24  ;;  %229 = vrot.lane.b32.xlu1 %v2744_v5, %s2672_s22 }
  0x5e   :  { %265 = vrot.lane.b32.xlu0 %v2730_v4, %s2673_s23 }
  0x65   :  { %178 = vrot.lane.b32.xlu1 %v2744_v5, %s2676_s26 }
  0x66   :  { %212 = vrot.lane.b32.xlu0 %v2744_v5, %s2675_s25 }
  0x6f   :  { %v2780_v6 = vpop.permute.xlu2 %242 }
  0x77   :  { %v2782_v7 = vpop.permute.xlu2 %244 }
  0x78   :  { %v253_v20 = vsel %vm4590_vm1, %v2780_v6, %v2782_v7 }
  0x79   :  { %v255_v22 = vmul.f32 %v2807_v19, %v253_v20 }
  0x7b   :  { %v338_v26 = vrot.slane %v255_v22, 4  ;;  %v2953_v22 = vand.u32 4294901760, %v381_v1 }
  0x7d   :  { %v367_v37 = vsel %vm358_vm6, %v2708_v2, %v338_v26  ;;  %v2935_v2 = vsel %vm2835_vm7, 1.0, %v4570_v18  ;;  %v60_v26 = vld [vmem:[#allocation5 + $0x8] sm:$0xff]  ;;  %vm4592_vm7 = vcmp.lt.s32.totalorder %v2784_v9, 17 }
  0x7e   :  { %v2879_v44 = vand.u32 4294901760, %v367_v37  ;;  %4641 = vst [vmem:[#allocation19_spill] sm:$0xff] %v2935_v2 }
  0x7f   :  { %v2786_v10 = vpop.permute.xlu2 %225 }
  0x80   :  { %v2900_v52 = vsub.f32 %v367_v37, %v2879_v44 }
  0x82   :  { %v4567_v61 = vand.u32 4294901760, %v2900_v52 }
  0x84   :  { %v450_v12 = vsub.f32 %v2900_v52, %v4567_v61 }
  0x87   :  { %v2797_v15 = vpop.permute.xlu1 %293  ;;  %v2799_v16 = vpop.permute.xlu2 %197 }
  0x88   :  { %v2801_v17 = vpop.permute.xlu0 %276 }
  0x8f   :  { %v296_v24 = vpop.permute.xlu1 %295  ;;  %v2832_v29 = vpop.permute.xlu2 %174 }
  0x90   :  { %v304_v27 = vsel %vm301_vm4, %v2797_v15, %v296_v24  ;;  %v2830_v28 = vpop.permute.xlu0 %278 }
  0x91   :  { %v306_v30 = vmul.f32 %v2823_v23, %v304_v27  ;;  %v287_v34 = vsel %vm284_vm5, %v2801_v17, %v2830_v28 }
  0x92   :  { %v289_v39 = vmul.f32 %v2842_v32, %v287_v34  ;;  %v451_v34 = vand.u32 4294901760, %v450_v12  ;;  %v3003_v12 = vadd.s32 384, %v2784_v9 }
  0x93   :  { %v375_v33 = vsel %vm358_vm6, %v306_v30, 0.0 }
  0x94   :  { %v2854_v38 = vand.u32 4294901760, %v375_v33  ;;  %v350_v48 = vrot.slane %v289_v39, 4  ;;  %v2970_v39 = vsub.f32 %v381_v1, %v2953_v22 }
  0x96   :  { %398 = vmatpush.msra.mxu0 %v2854_v38  ;;  %523 = vmatpush.msra.mxu3 %v2854_v38  ;;  %v2865_v40 = vsub.f32 %v375_v33, %v2854_v38 }
  0x97   :  { %v2867_v41 = vpop.permute.xlu1 %261  ;;  %v2894_v50 = vpop.permute.xlu2 %297 }
  0x98   :  { %v2881_v45 = vpop.permute.xlu0 %259  ;;  %487 = vmatpush.msra.mxu2 %v2865_v40  ;;  %v4569_v46 = vand.u32 4294901760, %v2865_v40  ;;  %v303_v56 = vsel %vm301_vm4, %v296_v24, %v2894_v50 }
  0x99   :  { %4637 = vst [vmem:[#allocation15_spill] sm:$0xff] %v2881_v45  ;;  %v270_v47 = vsel %vm267_vm9, %v2881_v45, %v2867_v41  ;;  %v307_v62 = vmul.f32 %v2904_v55, %v303_v56 }
  0x9a   :  { %v272_v49 = vmul.f32 %v2870_v42, %v270_v47  ;;  %v438_v51 = vsub.f32 %v2865_v40, %v4569_v46  ;;  %v384_v47 = vsel %vm379_vm13, %v60_v26, 0  ;;  %vm143_vm13 = vmand %vm139_vm11, %vm3032_vm12 }
  0x9b   :  { %v376_v20 = vsel %vm358_vm6, %v307_v62, 0.0  ;;  %v2990_v62 = vand.u32 4294901760, %v384_v47 }
  0x9c   :  { %v371_v53 = vsel %vm358_vm6, %v272_v49, %v350_v48  ;;  %v439_v54 = vand.u32 4294901760, %v438_v51  ;;  %v2959_v30 = vand.u32 4294901760, %v376_v20 }
  0x9d   :  { %v2909_v57 = vand.u32 4294901760, %v371_v53 }
  0x9e   :  { %440 = vmatpush.msra.mxu1 %v439_v54  ;;  %v2984_v54 = vsel %vm78_vm15, 1.0, %v4570_v18 }
  0x9f   :  { %400 = vmatpush.msra.mxu0 %v2909_v57  ;;  %525 = vmatpush.msra.mxu3 %v2909_v57  ;;  %v2915_v59 = vpop.permute.xlu1 %191  ;;  %v2918_v60 = vsub.f32 %v371_v53, %v2909_v57  ;;  %v2955_v24 = vpop.permute.xlu2 %227  ;;  %v2979_v53 = vsub.f32 %v376_v20, %v2959_v30  ;;  %4645 = vst [vmem:[#allocation23_spill] sm:$0xff] %v2984_v54 }
  0xa0   :  { %v2923_v63 = vpop.permute.xlu0 %231  ;;  %4642 = vst [vmem:[#allocation20_spill] sm:$0xff] %v2955_v24  ;;  %v203_v56 = vsel %vm199_vm0, %v2799_v16, %v2915_v59 }
  0xa1   :  { %4640 = vst [vmem:[#allocation18_spill] sm:$0xff] %v2923_v63  ;;  %402 = vmatpush.msra.mxu0 %v2879_v44  ;;  %490 = vmatpush.msra.mxu2 %v2918_v60  ;;  %v4568_v0 = vand.u32 4294901760, %v2918_v60  ;;  %v237_v8 = vsel %vm233_vm14, %v2923_v63, %v2786_v10  ;;  %v204_v20 = vmul.f32 %v2984_v54, %v203_v56 }
  0xa2   :  { %527 = vmatpush.msra.mxu3 %v2879_v44  ;;  %v238_v27 = vmul.f32 %v2935_v2, %v237_v8  ;;  %v2998_v8 = vand.u32 4294901760, %v2970_v39 }
  0xa3   :  { %493 = vmatpush.msra.mxu2 %v2900_v52  ;;  %v444_v11 = vsub.f32 %v2918_v60, %v4568_v0  ;;  %v314_v0 = vrot.slane %v204_v20, 4  ;;  %v4651_v20 = vand.u32 4294901760, %v2979_v53 }
  0xa4   :  { %v326_v49 = vrot.slane %v238_v27, 4 }
  0xa5   :  { %v445_v25 = vand.u32 4294901760, %v444_v11 }
  0xa7   :  { %446 = vmatpush.msra.mxu1 %v445_v25  ;;  %v2961_v33 = vpop.permute.xlu1 %214  ;;  %v3007_v25 = vadd.s32 256, %v2784_v9  ;;  %v3009_v26 = vpop.permute.xlu2 %176 }
  0xa8   :  { %4643 = vst [vmem:[#allocation21_spill] sm:$0xff] %v2961_v33  ;;  %v2967_v37 = vpop.permute.xlu0 %208 }
  0xa9   :  { %v220_v48 = vsel %vm4591_vm3, %v2961_v33, %v2967_v37  ;;  %452 = vmatpush.msra.mxu1 %v451_v34  ;;  %v4655_v2 = vand.u32 15, %v3007_v25 }
  0xaa   :  { %v221_v51 = vmul.f32 %v2964_v14, %v220_v48  ;;  %v3023_v48 = vsub.f32 %v384_v47, %v2990_v62  ;;  %v73_v14 = vshra.s32 %v3003_v12, 4 }
  0xab   :  { %vm3082_vm11 = vcmp.le.s32.totalorder %v4655_v2, 14 }
  0xac   :  { %v363_v1 = vsel %vm358_vm6, %v221_v51, %v326_v49  ;;  %v410_v51 = vsub.f32 %v2970_v39, %v2998_v8  ;;  %v3065_v18 = vand.u32 4294901760, %v3023_v48 }
  0xad   :  { %v3000_v11 = vand.u32 4294901760, %v363_v1 }
  0xae   :  { %v3068_v54 = vand.u32 4294901760, %v410_v51  ;;  %v418_v2 = vsub.f32 %v3023_v48, %v3065_v18 }
  0xaf   :  { %404 = vmatpush.msra.mxu0 %v3000_v11  ;;  %529 = vmatpush.msra.mxu3 %v3000_v11  ;;  %v3016_v31 = vpop.permute.xlu1 %280  ;;  %v3019_v27 = vsub.f32 %v363_v1, %v3000_v11  ;;  %v249_v23 = vpop.permute.xlu2 %248 }
  0xb0   :  { %v3026_v49 = vpop.permute.xlu0 %180  ;;  %v286_v34 = vsel %vm284_vm5, %v2830_v28, %v3016_v31  ;;  %v4652_v28 = vand.u32 15, %v3003_v12 }
  0xb1   :  { %4647 = vst [vmem:[#allocation25_spill] sm:$0xff] %v3026_v49  ;;  %v186_v1 = vsel %vm4592_vm7, %v3026_v49, %v2832_v29  ;;  %496 = vmatpush.msra.mxu2 %v3019_v27  ;;  %v4573_v61 = vand.u32 4294901760, %v3019_v27  ;;  %v290_v55 = vmul.f32 %v3047_v21, %v286_v34  ;;  %v72_v21 = vshra.s32 %v3007_v25, 4 }
  0xb2   :  { %v187_v46 = vmul.f32 %v3014_v13, %v186_v1  ;;  %v667_v1 = vsub.f32 %v2979_v53, %v4651_v20  ;;  %vm3072_vm15 = vcmp.le.s32.totalorder %v4652_v28, 14  ;;  %v3127_v49 = vand.u32 15, %v73_v14 }
  0xb3   :  { %v456_v47 = vsub.f32 %v3019_v27, %v4573_v61  ;;  %v351_v63 = vrot.slane %v290_v55, 4  ;;  %v3141_v14 = vand.u32 4294901760, %v418_v2  ;;  %v4665_v56 = vand.u32 4294901760, %v3019_v27 }
  0xb4   :  { %v359_v35 = vsel %vm358_vm6, %v187_v46, %v314_v0  ;;  %v4658_v46 = vmov 0.0  }
  0xb5   :  { %v3076_v13 = vand.u32 4294901760, %v359_v35  ;;  %v457_v20 = vand.u32 4294901760, %v456_v47  ;;  %v3089_v0 = vsel %vm2874_vm10, 1.0, %v4658_v46  ;;  %v3092_v51 = vsel %vm143_vm13, 1.0, %v4658_v46  ;;  %vm3160_vm13 = vmand %vm79_vm2, %vm3032_vm12 }
  0xb6   :  { %v668_v47 = vand.u32 4294901760, %v667_v1  ;;  %v3104_v42 = vsel %vm3032_vm12, 1.0, %v4658_v46  ;;  %v3120_v32 = vsel %vm3072_vm15, 1.0, %v4658_v46  ;;  %vm81_vm12 = vcmp.ge.s32.totalorder %v3127_v49, 1 }
  0xb7   :  { %406 = vmatpush.msra.mxu0 %v3076_v13  ;;  %458 = vmatpush.msra.mxu1 %v457_v20  ;;  %v3095_v28 = vpop.permute.xlu1 %263  ;;  %v460_v34 = vsub.f32 %v359_v35, %v3076_v13  ;;  %v236_v20 = vsel %vm233_vm14, %v2786_v10, %v2955_v24  ;;  %4659 = vst [vmem:[#allocation27_spill] sm:$0xff] %v3120_v32  ;;  %v4660_v10 = vand.u32 4294901760, %v2865_v40 }
  0xb8   :  { %531 = vmatpush.msra.mxu3 %v3076_v13  ;;  %412 = vmatmul.f32.vlgmr.msra.gmra.mxu0 %v3068_v54  ;;  %v247_v35 = vpop.permute.xlu0 %246  ;;  %v269_v1 = vsel %vm267_vm9, %v2867_v41, %v3095_v28  ;;  %v3132_v41 = vsel %vm3082_vm11, 1.0, %v4658_v46  ;;  %v239_v40 = vmul.f32 %v3104_v42, %v236_v20 }
  0xb9   :  { %559 = vmatpush.msrb.mxu0 %v4660_v10  ;;  %v252_v33 = vsel %vm4590_vm1, %v2782_v7, %v247_v35  ;;  %v461_v58 = vand.u32 4294901760, %v460_v34  ;;  %v273_v45 = vmul.f32 %v3092_v51, %v269_v1  ;;  %499 = vmatpush.msra.mxu2 %v460_v34  ;;  %v4661_v7 = vand.u32 4294901760, %v2918_v60 }
  0xba   :  { %669 = vmatpush.msrb.mxu3 %v668_v47  ;;  %v256_v24 = vmul.f32 %v3089_v0, %v252_v33  ;;  %v3143_v47 = vand.u32 15, %v72_v21  ;;  %v254_v33 = vsel %vm4590_vm1, %v249_v23, %v2780_v6  ;;  %v251_v60 = vsel %vm4590_vm1, %v247_v35, %v249_v23  ;;  %502 = vmatmul.f32.vlgmr.msra.gmra.mxu2 %v2970_v39 }
  0xbb   :  { %535 = vmatmul.f32.vlgmr.msra.gmra.mxu3 %v2998_v8  ;;  %563 = vmatpush.msrb.mxu0 %v4661_v7  ;;  %v462_v55 = vsub.f32 %v460_v34, %v461_v58  ;;  %v372_v1 = vsel %vm358_vm6, %v273_v45, %v351_v63  ;;  %v4664_v21 = vand.u32 4294901760, %v2900_v52  ;;  %v3173_v45 = vsel %vm79_vm2, 1.0, %v4658_v46 }
  0xbc   :  { %627 = vmatpush.msrb.mxu2 %v2959_v30  ;;  %v339_v20 = vrot.slane %v256_v24, 4  ;;  %v3166_v34 = vand.u32 4294901760, %v372_v1  ;;  %v3176_v63 = vsel %vm111_vm8, 1.0, %v4658_v46  ;;  %vm140_vm10 = vcmp.le.s32.totalorder %v3143_v47, 14 }
  0xbd   :  { %567 = vmatpush.msrb.mxu0 %v4664_v21  ;;  %v463_v6 = vand.u32 4294901760, %v462_v55  ;;  %v258_v24 = vmul.f32 %v3120_v32, %v254_v33  ;;  %v257_v52 = vmul.f32 %v3132_v41, %v251_v60  ;;  %v327_v35 = vrot.slane %v239_v40, 4  ;;  %vm3226_vm8 = vmand %vm140_vm10, %vm3082_vm11 }
  0xbe   :  { %v368_v23 = vsel %vm358_vm6, %v2710_v3, %v339_v20  ;;  %v3188_v36 = vsub.f32 %v372_v1, %v3166_v34  ;;  %v3193_v10 = vsel %vm3160_vm13, 1.0, %v4658_v46  ;;  %629 = vmatpush.msrb.mxu2 %v3166_v34  ;;  %v185_v40 = vsel %vm4592_vm7, %v2832_v29, %v3009_v26 }
  0xbf   :  { %571 = vmatpush.msrb.mxu0 %v4665_v56  ;;  %464 = vmatpush.msra.mxu1 %v463_v6  ;;  %v3183_v2 = vpop.permute.xlu1 %210  ;;  %v3185_v3 = vand.u32 4294901760, %v368_v23  ;;  %vm141_vm2 = vcmp.le.s32.totalorder %v3127_v49, 14  ;;  %v340_v20 = vrot.slane %v257_v52, 4  ;;  %v188_v43 = vmul.f32 %v3193_v10, %v185_v40 }
  0xc0   :  { %420 = vmatmul.f32.gmra.mxu0 %v3141_v14  ;;  %v3198_v27 = vpop.permute.xlu0 %193  ;;  %v219_v7 = vsel %vm4591_vm3, %v2967_v37, %v3183_v2  ;;  %466 = vmatmul.f32.vlgmr.msra.gmra.mxu1 %v2953_v22  ;;  %v4595_v60 = vand.u32 4294901760, %v3188_v36  ;;  %v3251_v56 = vsel %vm3226_vm8, 1.0, %v4658_v46  ;;  %vm3260_vm13 = vmand %vm141_vm2, %vm3072_vm15  ;;  %vm80_vm1 = vcmp.ge.s32.totalorder %v3143_v47, 1 }
  0xc1   :  { %575 = vmatpush.msrb.mxu0 %v461_v58  ;;  %v202_v55 = vsel %vm199_vm0, %v2915_v59, %v3198_v27  ;;  %v222_v33 = vmul.f32 %v3176_v63, %v219_v7  ;;  %597 = vmatpush.msrb.mxu1 %v2854_v38  ;;  %v3219_v29 = vsub.f32 %v368_v23, %v3185_v3  ;;  %v341_v59 = vrot.slane %v258_v24, 4  ;;  %v196_v7 = vpop.permute.xlu2 %195 }
  0xc2   :  { %v205_v37 = vmul.f32 %v3173_v45, %v202_v55  ;;  %631 = vmatpush.msrb.mxu2 %v3185_v3  ;;  %v673_v1 = vsub.f32 %v3188_v36, %v4595_v60  ;;  %v3245_v24 = vsel %vm81_vm12, 1.0, %v4658_v46  ;;  %v369_v58 = vsel %vm358_vm6, %v2744_v5, %v340_v20 }
  0xc3   :  { %v364_v38 = vsel %vm358_vm6, %v222_v33, %v327_v35  ;;  %716 = vmatpush.msra.mxu0 %v2979_v53  ;;  %541 = vmatmul.f32.gmra.mxu3 %v3065_v18  ;;  %v4593_v23 = vand.u32 4294901760, %v3219_v29  ;;  %4668 = vst [vmem:[#allocation28_spill] sm:$0xff] %v3245_v24  ;;  %v4671_v33 = vand.u32 15, %v3007_v25  ;;  %v3289_v25 = vsel %vm140_vm10, 1.0, %v4658_v46 }
  0xc4   :  { %v315_v21 = vrot.slane %v205_v37, 4  ;;  %599 = vmatpush.msrb.mxu1 %v2909_v57  ;;  %507 = vmatmul.f32.gmra.mxu2 %v3023_v48  ;;  %v3239_v6 = vand.u32 4294901760, %v364_v38  ;;  %v674_v52 = vand.u32 4294901760, %v673_v1  ;;  %v2678_v57 = vmov 113  }
  0xc5   :  { %719 = vmatpush.msra.mxu0 %v3188_v36  ;;  %2579 = vset.pattern.permute.xlu0 %v2678_v57  ;;  %v679_v40 = vsub.f32 %v3219_v29, %v4593_v23  ;;  %vm3272_vm8 = vcmp.ge.s32.totalorder %v4671_v33, 1  ;;  %v370_v37 = vsel %vm358_vm6, %v2730_v4, %v341_v59 }
  0xc6   :  { %v360_v35 = vsel %vm358_vm6, %v188_v43, %v315_v21  ;;  %601 = vmatpush.msrb.mxu1 %v2879_v44  ;;  %633 = vmatpush.msrb.mxu2 %v3239_v6  ;;  %v3268_v55 = vsub.f32 %v364_v38, %v3239_v6  ;;  %vm3315_vm7 = vmand %vm140_vm10, %vm3272_vm8  ;;  %v3331_v33 = vand.u32 4294901760, %v370_v37  ;;  %v4703_v44 = vld [vmem:[#allocation17_spill] sm:$0xff] }
  0xc7   :  { %722 = vmatpush.msra.mxu0 %v3219_v29  ;;  %675 = vmatpush.msrb.mxu3 %v674_v52  ;;  %v300_v1 = vpop.permute.xlu1 %299  ;;  %v3282_v38 = vand.u32 4294901760, %v360_v35  ;;  %v680_v59 = vand.u32 4294901760, %v679_v40  ;;  %v4675_v52 = vand.u32 15, %v3003_v12  ;;  %v3329_v40 = vand.u32 4294901760, %v369_v58 }
  0xc8   :  { %603 = vmatpush.msrb.mxu1 %v3000_v11  ;;  %577 = vmatmul.f32.vlgmr.msrb.gmra.mxu0 %v2953_v22  ;;  %v283_v4 = vpop.permute.xlu0 %282  ;;  %v302_v5 = vsel %vm301_vm4, %v2894_v50, %v300_v1  ;;  %v4594_v20 = vand.u32 4294901760, %v3268_v55  ;;  %v3299_v11 = vsel %vm3260_vm13, 1.0, %v4658_v46  ;;  %v305_v43 = vsel %vm301_vm4, %v300_v1, %v2797_v15 }
  0xc9   :  { %470 = vmatmul.f32.gmra.mxu1 %v2990_v62  ;;  %4674 = vst [vmem:[#allocation29_spill] sm:$0xff] %v3299_v11  ;;  %v308_v21 = vmul.f32 %v3251_v56, %v302_v5  ;;  %vm3307_vm3 = vcmp.ge.s32.totalorder %v4675_v52, 1  ;;  %v3323_v15 = vsel %vm141_vm2, 1.0, %v4658_v46  ;;  %635 = vmatpush.msrb.mxu2 %v3282_v38  ;;  %v3327_v12 = vsub.f32 %v360_v35, %v3282_v38 }
  0xca   :  { %605 = vmatpush.msrb.mxu1 %v3076_v13  ;;  %4680 = vst [vmem:[#allocation30_spill] sm:$0xff] %v3323_v15  ;;  %v285_v1 = vsel %vm284_vm5, %v3016_v31, %v283_v4  ;;  %v288_v13 = vsel %vm284_vm5, %v283_v4, %v2801_v17  ;;  %681 = vmatpush.msrb.mxu3 %v680_v59  ;;  %v3347_v52 = vsel %vm80_vm1, 1.0, %v4658_v46  ;;  %v4682_v17 = vand.u32 4294901760, %v2979_v53  ;;  %vm3359_vm10 = vmand %vm141_vm2, %vm3307_vm3 }
  0xcb   :  { %v377_v5 = vsel %vm358_vm6, %v308_v21, 0.0  ;;  %725 = vmatpush.msra.mxu0 %v3268_v55  ;;  %v685_v35 = vsub.f32 %v3268_v55, %v4594_v20  ;;  %4681 = vst [vmem:[#allocation31_spill] sm:$0xff] %v3347_v52  ;;  %v309_v31 = vmul.f32 %v3299_v11, %v305_v43  ;;  %v3366_v59 = vsel %vm3315_vm7, 1.0, %v4658_v46  ;;  %vm3420_vm7 = vmand %vm80_vm1, %vm3082_vm11  ;;  %1311 = vperm.xlu0 %2579, %v4703_v44  }
  0xcc   :  { %v3350_v23 = vand.u32 4294901760, %v377_v5  ;;  %752 = vmatpush.msra.mxu1 %v2959_v30  ;;  %788 = vmatpush.msra.mxu2 %v4682_v17  ;;  %v200_v43 = vsel %vm199_vm0, %v196_v7, %v2799_v16  ;;  %v3376_v21 = vsel %vm3272_vm8, 1.0, %v4658_v46  ;;  %v690_v17 = vand.u32 4294901760, %v3327_v12  ;;  %vm3439_vm11 = vmand %vm81_vm12, %vm3072_vm15 }
  0xcd   :  { %728 = vmatpush.msra.mxu0 %v3327_v12  ;;  %641 = vmatmul.f32.vlgmr.msrb.gmra.mxu2 %v3068_v54  ;;  %v686_v53 = vand.u32 4294901760, %v685_v35  ;;  %4685 = vst [vmem:[#allocation32_spill] sm:$0xff] %v3376_v21  ;;  %v291_v57 = vmul.f32 %v3289_v25, %v285_v1  ;;  %v292_v20 = vmul.f32 %v3323_v15, %v288_v13  ;;  %v4686_v16 = vand.u32 4294901760, %v3188_v36  ;;  %vm3452_vm2 = vmand %vm80_vm1, %vm3272_vm8 }
  0xce   :  { %v3382_v60 = vsub.f32 %v377_v5, %v3350_v23  ;;  %754 = vmatpush.msra.mxu1 %v3166_v34  ;;  %v3390_v35 = vsel %vm3307_vm3, 1.0, %v4658_v46  ;;  %v3396_v1 = vsel %vm3359_vm10, 1.0, %v4658_v46  ;;  %v691_v5 = vsub.f32 %v3327_v12, %v690_v17  ;;  %vm3467_vm15 = vmand %vm81_vm12, %vm3307_vm3 }
  0xcf   :  { %792 = vmatpush.msra.mxu2 %v4686_v16  ;;  %4687 = vst [vmem:[#allocation33_spill] sm:$0xff] %v3390_v35  ;;  %687 = vmatpush.msrb.mxu3 %v686_v53  ;;  %v230_v13 = vpop.permute.xlu1 %229  ;;  %v3400_v32 = vsub.f32 %v369_v58, %v3329_v40  ;;  %v3403_v36 = vsub.f32 %v370_v37, %v3331_v33  ;;  %v378_v4 = vsel %vm358_vm6, %v309_v31, 0.0  ;;  %v4689_v15 = vand.u32 4294901760, %v3219_v29  ;;  %v4692_v29 = vld [vmem:[#allocation15_spill] sm:$0xff] }
  0xd0   :  { %856 = vmatpush.msrb.mxu0 %v3350_v23  ;;  %4688 = vst [vmem:[#allocation34_spill] sm:$0xff] %v3396_v1  ;;  %v3406_v16 = vmul.f32 %v3245_v24, %v200_v43  ;;  %v201_v53 = vsel %vm199_vm0, %v3198_v27, %v196_v7  ;;  %756 = vmatpush.msra.mxu1 %v3185_v3  ;;  %v266_v12 = vpop.permute.xlu0 %265  ;;  %v692_v31 = vand.u32 4294901760, %v691_v5  ;;  %v352_v58 = vrot.slane %v291_v57, 4 }
  0xd1   :  { %796 = vmatpush.msra.mxu2 %v4689_v15  ;;  %581 = vmatmul.f32.gmra.mxu0 %v2990_v62  ;;  %v268_v27 = vsel %vm267_vm9, %v3095_v28, %v266_v12  ;;  %v271_v7 = vsel %vm267_vm9, %v266_v12, %v4692_v29  ;;  %v4693_v15 = vld [vmem:[#allocation20_spill] sm:$0xff]  ;;  %v353_v24 = vrot.slane %v292_v20, 4  ;;  %v4696_v29 = vand.u32 4294901760, %v3268_v55  ;;  %v4699_v20 = vld [vmem:[#allocation18_spill] sm:$0xff] }
  0xd2   :  { %607 = vmatmul.f32.vlgmr.msrb.gmra.mxu1 %v2953_v22  ;;  %v235_v19 = vsel %vm233_vm14, %v4693_v15, %v230_v13  ;;  %v274_v28 = vmul.f32 %v3366_v59, %v268_v27  ;;  %v275_v12 = vmul.f32 %v3396_v1, %v271_v7  ;;  %v206_v57 = vmul.f32 %v3347_v52, %v201_v53 }
  0xd3   :  { %758 = vmatpush.msra.mxu1 %v3239_v6  ;;  %800 = vmatpush.msra.mxu2 %v4696_v29  ;;  %v234_v5 = vsel %vm233_vm14, %v230_v13, %v4699_v20  ;;  %v4700_v27 = vand.u32 4294901760, %v3382_v60  ;;  %v907_v53 = vand.u32 4294901760, %v3400_v32  ;;  %v3473_v7 = vand.u32 4294901760, %v378_v4  ;;  %v4708_v20 = vld [vmem:[#allocation25_spill] sm:$0xff] }
  0xd4   :  { %693 = vmatpush.msrb.mxu3 %v692_v31  ;;  %v373_v13 = vsel %vm358_vm6, %v274_v28, %v352_v58  ;;  %v374_v15 = vsel %vm358_vm6, %v275_v12, %v353_v24  ;;  %v240_v31 = vmul.f32 %v3376_v21, %v235_v19  ;;  %v317_v49 = vrot.slane %v3406_v16, 4 }
  0xd5   :  { %v896_v55 = vsub.f32 %v3382_v60, %v4700_v27  ;;  %760 = vmatpush.msra.mxu1 %v3282_v38  ;;  %695 = vmatmul.f32.vlgmr.msrb.gmra.mxu3 %v2953_v22  ;;  %v3482_v50 = vand.u32 4294901760, %v373_v13  ;;  %v3487_v58 = vsel %vm3420_vm7, 1.0, %v4658_v46  ;;  %v241_v24 = vmul.f32 %v3390_v35, %v234_v5  ;;  %v4711_v27 = vld [vmem:[#allocation21_spill] sm:$0xff] }
  0xd6   :  { %804 = vmatpush.msra.mxu2 %v690_v17  ;;  %826 = vmatpush.msra.mxu3 %v2959_v30  ;;  %4704 = vst [vmem:[#allocation15_spill] sm:$0xff] %v3487_v58  ;;  %v3494_v19 = vsel %vm3439_vm11, 1.0, %v4658_v46  ;;  %v3499_v30 = vsel %vm3452_vm2, 1.0, %v4658_v46  ;;  %v3504_v17 = vsel %vm3467_vm15, 1.0, %v4658_v46  ;;  %v316_v16 = vrot.slane %v206_v57, 4 }
  0xd7   :  { %v897_v29 = vand.u32 4294901760, %v896_v55  ;;  %4705 = vst [vmem:[#allocation20_spill] sm:$0xff] %v3494_v19  ;;  %649 = vmatmul.f32.gmra.mxu2 %v3141_v14  ;;  %v179_v37 = vpop.permute.xlu1 %178  ;;  %v3509_v43 = vsub.f32 %v373_v13, %v3482_v50  ;;  %v908_v28 = vsub.f32 %v3400_v32, %v907_v53  ;;  %v3514_v12 = vand.u32 4294901760, %v374_v15  ;;  %858 = vmatpush.msrb.mxu0 %v3482_v50 }
  0xd8   :  { %945 = vmatpush.msrb.mxu2 %v3382_v60  ;;  %4706 = vst [vmem:[#allocation18_spill] sm:$0xff] %v3499_v30  ;;  %828 = vmatpush.msra.mxu3 %v3166_v34  ;;  %v3517_v61 = vsub.f32 %v378_v4, %v3473_v7  ;;  %v328_v46 = vrot.slane %v240_v31, 4  ;;  %v213_v57 = vpop.permute.xlu0 %212  ;;  %vm4709_vm1 = vcmp.lt.s32.totalorder %v2784_v9, 17  ;;  %vm4712_vm12 = vcmp.lt.s32.totalorder %v2784_v9, 15 }
  0xd9   :  { %4707 = vst [vmem:[#allocation17_spill] sm:$0xff] %v3504_v17  ;;  %898 = vmatpush.msrb.mxu1 %v897_v29  ;;  %v183_v34 = vsel %vm4709_vm1, %v179_v37, %v4708_v20  ;;  %vm4710_vm3 = vmmov %vm4709_vm1  ;;  %v217_v4 = vsel %vm4712_vm12, %v213_v57, %v4711_v27  ;;  %v901_v13 = vand.u32 4294901760, %v3509_v43  ;;  %v329_v31 = vrot.slane %v241_v24, 4  ;;  %860 = vmatpush.msrb.mxu0 %v3329_v40 }
  0xda   :  { %v184_v5 = vsel %vm4710_vm3, %v3009_v26, %v179_v37  ;;  %830 = vmatpush.msra.mxu3 %v3185_v3  ;;  %611 = vmatmul.f32.gmra.mxu1 %v2990_v62  ;;  %vm4713_vm13 = vmmov %vm4712_vm12  ;;  %v224_v26 = vmul.f32 %v3494_v19, %v217_v4  ;;  %v190_v3 = vmul.f32 %v3504_v17, %v183_v34  ;;  %v909_v4 = vand.u32 4294901760, %v908_v28 }
  0xdb   :  { %v218_v55 = vsel %vm4713_vm13, %v3183_v2, %v213_v57  ;;  %v189_v47 = vmul.f32 %v3499_v30, %v184_v5  ;;  %948 = vmatpush.msrb.mxu2 %v3509_v43  ;;  %731 = vmatmul.f32.vlgmr.msra.gmra.mxu0 %v2970_v39  ;;  %v902_v2 = vsub.f32 %v3509_v43, %v901_v13  ;;  %vm1452_vm8 = vcmask 588800   ;;  %vm4736_vm7 = vmmov %vm4709_vm1 }
  0xdc   :  { %v223_v29 = vmul.f32 %v3487_v58, %v218_v55  ;;  %832 = vmatpush.msra.mxu3 %v3239_v6  ;;  %v3546_v24 = vsub.f32 %v374_v15, %v3514_v12  ;;  %v366_v20 = vsel %vm358_vm6, %v224_v26, %v329_v31  ;;  %v1124_v6 = vand.u32 4294901760, %v3517_v61  ;;  %vm4737_vm11 = vmmov %vm4712_vm12 }
  0xdd   :  { %v361_v37 = vsel %vm358_vm6, %v189_v47, %v316_v16  ;;  %699 = vmatmul.f32.gmra.mxu3 %v2990_v62  ;;  %951 = vmatpush.msrb.mxu2 %v3400_v32  ;;  %v362_v16 = vsel %vm358_vm6, %v190_v3, %v317_v49  ;;  %v903_v15 = vand.u32 4294901760, %v902_v2  ;;  %v3559_v5 = vand.u32 4294901760, %v366_v20  ;;  %vm4741_vm2 = vmmov %vm4737_vm11 }
  0xde   :  { %v365_v57 = vsel %vm358_vm6, %v223_v29, %v328_v46  ;;  %v3552_v34 = vand.u32 4294901760, %v361_v37  ;;  %834 = vmatpush.msra.mxu3 %v3282_v38  ;;  %v2679_v46 = vmov 112   ;;  %v1130_v38 = vand.u32 4294901760, %v3546_v24  ;;  %vm4745_vm15 = vmmov %vm4709_vm1 }
  0xdf   :  { %v3557_v43 = vand.u32 4294901760, %v365_v57  ;;  %2578 = vset.pattern.permute.xlu2 %v2679_v46  ;;  %806 = vmatmul.f32.vlgmr.msra.gmra.mxu2 %v2953_v22  ;;  %v3569_v55 = vand.u32 4294901760, %v362_v16  ;;  %v1136_v31 = vand.u32 4294901760, %v3403_v36  ;;  %v3578_v29 = vsub.f32 %v366_v20, %v3559_v5 }
  0xe0   :  { %981 = vmatpush.msrb.mxu3 %v3350_v23  ;;  %v918_v27 = vsub.f32 %v361_v37, %v3552_v34  ;;  %1303 = vperm.xlu2 %2578, %v4703_v44   ;;  %v1125_v44 = vsub.f32 %v3517_v61, %v1124_v6  ;;  %v1131_v26 = vsub.f32 %v3546_v24, %v1130_v38  ;;  %v4714_v37 = vand.u32 4294901760, %v3382_v60 }
  0xe1   :  { %862 = vmatpush.msrb.mxu0 %v3557_v43  ;;  %v912_v49 = vsub.f32 %v365_v57, %v3557_v43  ;;  %904 = vmatpush.msrb.mxu1 %v903_v15  ;;  %v1147_v2 = vsub.f32 %v362_v16, %v3569_v55  ;;  %v1137_v15 = vsub.f32 %v3403_v36, %v1136_v31  ;;  %v1142_v46 = vand.u32 4294901760, %v3578_v29 }
  0xe2   :  { %983 = vmatpush.msrb.mxu3 %v3482_v50  ;;  %764 = vmatmul.f32.vlgmr.msra.gmra.mxu1 %v2998_v8  ;;  %v919_v28 = vand.u32 4294901760, %v918_v27  ;;  %v1126_v57 = vand.u32 4294901760, %v1125_v44  ;;  %v1132_v60 = vand.u32 4294901760, %v1131_v26  ;;  %vm4726_vm6 = vcmp.lt.s32.totalorder %v2784_v9, 127 }
  0xe3   :  { %864 = vmatpush.msrb.mxu0 %v3552_v34  ;;  %v913_v47 = vand.u32 4294901760, %v912_v49  ;;  %910 = vmatpush.msrb.mxu1 %v909_v4  ;;  %v1148_v16 = vand.u32 4294901760, %v1147_v2  ;;  %v1138_v4 = vand.u32 4294901760, %v1137_v15  ;;  %v1143_v44 = vsub.f32 %v3578_v29, %v1142_v46  ;;  %vm4734_vm10 = vmmov %vm4726_vm6 }
  0xe4   :  { %985 = vmatpush.msrb.mxu3 %v3329_v40  ;;  %954 = vmatpush.msrb.mxu2 %v912_v49  ;;  %vm4768_vm1 = vmmov %vm4726_vm6 }
  0xe5   :  { %736 = vmatmul.f32.gmra.mxu0 %v3023_v48  ;;  %v914_v3 = vsub.f32 %v912_v49, %v913_v47  ;;  %836 = vmatmul.f32.vlgmr.msra.gmra.mxu3 %v2953_v22  ;;  %v920_v49 = vsub.f32 %v918_v27, %v919_v28  ;;  %v1144_v32 = vand.u32 4294901760, %v1143_v44 }
  0xe6   :  { %987 = vmatpush.msrb.mxu3 %v3557_v43  ;;  %1017 = vmatpush.msra.mxu0 %v4714_v37 }
  0xe7   :  { %957 = vmatpush.msrb.mxu2 %v918_v27  ;;  %v915_v20 = vand.u32 4294901760, %v914_v3  ;;  %v1149_v27 = vsub.f32 %v1147_v2, %v1148_v16 }
  0xe8   :  { %989 = vmatpush.msrb.mxu3 %v3552_v34  ;;  %1021 = vmatpush.msra.mxu0 %v901_v13  ;;  %v921_v13 = vand.u32 4294901760, %v920_v49 }
  0xe9   :  { %810 = vmatmul.f32.gmra.mxu2 %v2990_v62  ;;  %916 = vmatpush.msrb.mxu1 %v915_v20 }
  0xea   :  { %1127 = vmatpush.msra.mxu3 %v1126_v57  ;;  %1085 = vmatpush.msra.mxu2 %v3473_v7 }
  0xeb   :  { %1025 = vmatpush.msra.mxu0 %v907_v53  ;;  %770 = vmatmul.f32.gmra.mxu1 %v3065_v18  ;;  %v1150_v53 = vand.u32 4294901760, %v1149_v27 }
  0xec   :  { %1133 = vmatpush.msra.mxu3 %v1132_v60  ;;  %1087 = vmatpush.msra.mxu2 %v3514_v12 }
  0xed   :  { %1029 = vmatpush.msra.mxu0 %v913_v47  ;;  %922 = vmatpush.msrb.mxu1 %v921_v13 }
  0xee   :  { %1139 = vmatpush.msra.mxu3 %v1138_v4  ;;  %1089 = vmatpush.msra.mxu2 %v3331_v33 }
  0xef   :  { %840 = vmatmul.f32.gmra.mxu3 %v2990_v62  ;;  %870 = vmatmul.f32.vlgmr.msrb.gmra.mxu0 %v3068_v54 }
  0xf0   :  { %1033 = vmatpush.msra.mxu0 %v919_v28  ;;  %1055 = vmatpush.msra.mxu1 %v3350_v23 }
  0xf1   :  { %1091 = vmatpush.msra.mxu2 %v3559_v5  ;;  %1145 = vmatpush.msra.mxu3 %v1144_v32 }
  0xf2   :  { %1174 = vmatpush.msrb.mxu0 %v3517_v61  ;;  %960 = vmatmul.f32.vlgmr.msrb.gmra.mxu2 %v2970_v39 }
  0xf3   :  { %1057 = vmatpush.msra.mxu1 %v3482_v50  ;;  %1093 = vmatpush.msra.mxu2 %v3569_v55 }
  0xf4   :  { %1151 = vmatpush.msra.mxu3 %v1150_v53  ;;  %1177 = vmatpush.msrb.mxu0 %v3546_v24 }
  0xf5   :  { %1246 = vmatpush.msrb.mxu2 %v1124_v6  ;;  %1059 = vmatpush.msra.mxu1 %v3329_v40 }
  0xf6   :  { %1180 = vmatpush.msrb.mxu0 %v3403_v36  ;;  %924 = vmatmul.f32.vlgmr.msrb.gmra.mxu1 %v2953_v22 }
  0xf7   :  { %1250 = vmatpush.msrb.mxu2 %v1130_v38  ;;  %1061 = vmatpush.msra.mxu1 %v3557_v43 }
  0xf8   :  { %1183 = vmatpush.msrb.mxu0 %v3578_v29  ;;  %993 = vmatmul.f32.vlgmr.msrb.gmra.mxu3 %v2998_v8 }
  0xf9   :  { %1254 = vmatpush.msrb.mxu2 %v1136_v31  ;;  %878 = vmatmul.f32.gmra.mxu0 %v3141_v14 }
  0xfa   :  { %1063 = vmatpush.msra.mxu1 %v3552_v34  ;;  %1284 = vmatpush.msrb.mxu3 %v3473_v7 }
  0xfb   :  { %1186 = vmatpush.msrb.mxu0 %v1147_v2  ;;  %1258 = vmatpush.msrb.mxu2 %v1142_v46 }
  0xfc   :  { %1210 = vmatpush.msrb.mxu1 %v3473_v7  ;;  %1286 = vmatpush.msrb.mxu3 %v3514_v12 }
  0xfd   :  { %965 = vmatmul.f32.gmra.mxu2 %v3023_v48 }
  0xfe   :  { %1212 = vmatpush.msrb.mxu1 %v3514_v12  ;;  %1262 = vmatpush.msrb.mxu2 %v1148_v16 }
  0xff   :  { %1288 = vmatpush.msrb.mxu3 %v3331_v33  ;;  %928 = vmatmul.f32.gmra.mxu1 %v2990_v62 }
 0x100   :  { %1214 = vmatpush.msrb.mxu1 %v3331_v33  ;;  %999 = vmatmul.f32.gmra.mxu3 %v3065_v18 }
 0x101   :  { %1290 = vmatpush.msrb.mxu3 %v3559_v5  ;;  %1035 = vmatmul.f32.vlgmr.msra.gmra.mxu0 %v2953_v22 }
 0x102   :  { %1216 = vmatpush.msrb.mxu1 %v3559_v5 }
 0x103   :  { %1292 = vmatpush.msrb.mxu3 %v3569_v55 }
 0x104   :  { %1218 = vmatpush.msrb.mxu1 %v3569_v55 }
 0x105   :  { %1099 = vmatmul.f32.vlgmr.msra.gmra.mxu2 %v3068_v54 }
 0x107   :  { %1065 = vmatmul.f32.vlgmr.msra.gmra.mxu1 %v2953_v22 }
 0x108   :  { %1153 = vmatmul.f32.vlgmr.msra.gmra.mxu3 %v2953_v22 }
 0x109   :  { %1039 = vmatmul.f32.gmra.mxu0 %v2990_v62 }
 0x10d   :  { %1107 = vmatmul.f32.gmra.mxu2 %v3141_v14 }
 0x10f   :  { %1069 = vmatmul.f32.gmra.mxu1 %v2990_v62 }
 0x110   :  { %1157 = vmatmul.f32.gmra.mxu3 %v2990_v62 }
 0x111   :  { %1189 = vmatmul.f32.vlgmr.msrb.gmra.mxu0 %v2970_v39 }
 0x115   :  { %1264 = vmatmul.f32.vlgmr.msrb.gmra.mxu2 %v2953_v22 }
 0x117   :  { %1222 = vmatmul.f32.vlgmr.msrb.gmra.mxu1 %v2998_v8 }
 0x118   :  { %1294 = vmatmul.f32.vlgmr.msrb.gmra.mxu3 %v2953_v22 }
 0x119   :  { %1194 = vmatmul.f32.gmra.mxu0 %v3023_v48 }
 0x11d   :  { %1268 = vmatmul.f32.gmra.mxu2 %v2990_v62 }
 0x11f   :  { %1228 = vmatmul.f32.gmra.mxu1 %v3065_v18 }
 0x120   :  { %1298 = vmatmul.f32.gmra.mxu3 %v2990_v62 }
 0x135   :  { %v413_v54 = vpop.f32.mrf.mxu0 }
 0x13a   :  { %v3651_v6 = vpop.permute.xlu2 %1303 }
 0x13d   :  { %v421_v14 = vpop.f32.mrf.mxu0  ;;  %v467_v23 = vpop.f32.mrf.mxu1 }
 0x13e   :  { %v536_v40 = vpop.f32.mrf.mxu3  ;;  %v503_v33 = vpop.f32.mrf.mxu2  ;;  %v468_v39 = vadd.f32 %v467_v23, %v413_v54 }
 0x13f   :  { %v3653_v55 = vpop.permute.xlu0 %1311 }
 0x140   :  { %v504_v36 = vadd.f32 %v503_v33, %v468_v39 }
 0x142   :  { %v537_v61 = vadd.f32 %v536_v40, %v504_v36 }
 0x145   :  { %v578_v7 = vpop.f32.mrf.mxu0 }
 0x146   :  { %v471_v50 = vpop.f32.mrf.mxu1  ;;  %v542_v22 = vpop.f32.mrf.mxu3  ;;  %v579_v34 = vadd.f32 %v578_v7, %v537_v61 }
 0x147   :  { %v472_v8 = vadd.f32 %v471_v50, %v421_v14  ;;  %v508_v12 = vpop.f32.mrf.mxu2 }
 0x149   :  { %v509_v48 = vadd.f32 %v508_v12, %v472_v8 }
 0x14b   :  { %v543_v24 = vadd.f32 %v542_v22, %v509_v48 }
 0x14e   :  { %v582_v18 = vpop.f32.mrf.mxu0 }
 0x14f   :  { %v608_v62 = vpop.f32.mrf.mxu1  ;;  %v583_v43 = vadd.f32 %v582_v18, %v543_v24 }
 0x150   :  { %v609_v5 = vadd.f32 %v608_v62, %v579_v34  ;;  %v642_v38 = vpop.f32.mrf.mxu2 }
 0x152   :  { %v1306_v47 = vmul.f32 %v3651_v6, %v609_v5 }
 0x154   :  { %v1314_v31 = vadd.f32 %v3653_v55, %v1306_v47  ;;  %v3693_v47 = vld [vmem:[#allocation5] sm:$0xff] }
 0x155   :  { %4717 = vst [vmem:[#allocation35_spill] sm:$0xff] %v3693_v47 }
 0x156   :  { %v3657_v29 = vmax.f32 %v1314_v31, 0.0 }
 0x157   :  { %v612_v28 = vpop.f32.mrf.mxu1 }
 0x158   :  { %v3659_v26 = vadd.f32 %v612_v28, %v583_v43  ;;  %v696_v3 = vpop.f32.mrf.mxu3  ;;  %1386 = vrot.lane.b32.xlu2 %v3657_v29, %s2669_s0  ;;  %1402 = vrot.lane.b32.xlu0 %v3657_v29, %s2673_s23  ;;  %v732_v37 = vpop.f32.mrf.mxu0 }
 0x159   :  { %1434 = vrot.lane.b32.xlu1 %v3657_v29, %s2670_s1  ;;  %v697_v57 = vadd.f32 %v696_v3, %v642_v38 }
 0x15a   :  { %4715 = vst [vmem:[#allocation25_spill] sm:$0xff] %v3659_v26  ;;  %v650_v2 = vpop.f32.mrf.mxu2 }
 0x15b   :  { %v733_v60 = vadd.f32 %v732_v37, %v697_v57 }
 0x15f   :  { %v765_v20 = vpop.f32.mrf.mxu1 }
 0x160   :  { %v700_v15 = vpop.f32.mrf.mxu3  ;;  %1322 = vrot.lane.b32.xlu2 %v3657_v29, %s2676_s26  ;;  %1370 = vrot.lane.b32.xlu0 %v3657_v29, %s2672_s22  ;;  %v766_v44 = vadd.f32 %v765_v20, %v733_v60 }
 0x161   :  { %v701_v46 = vadd.f32 %v700_v15, %v650_v2  ;;  %1418 = vrot.lane.b32.xlu1 %v3657_v29, %s2671_s21 }
 0x162   :  { %v737_v49 = vpop.f32.mrf.mxu0  ;;  %v807_v4 = vpop.f32.mrf.mxu2 }
 0x163   :  { %v738_v16 = vadd.f32 %v737_v49, %v701_v46  ;;  %v808_v13 = vadd.f32 %v807_v4, %v766_v44 }
 0x168   :  { %v771_v27 = vpop.f32.mrf.mxu1  ;;  %1354 = vrot.lane.b32.xlu0 %v3657_v29, %s2675_s25  ;;  %v837_v53 = vpop.f32.mrf.mxu3 }
 0x169   :  { %v772_v32 = vadd.f32 %v771_v27, %v738_v16  ;;  %v838_v54 = vadd.f32 %v837_v53, %v808_v13 }
 0x16b   :  { %v1307_v40 = vmul.f32 %v3651_v6, %v838_v54 }
 0x16c   :  { %v811_v14 = vpop.f32.mrf.mxu2  ;;  %v871_v23 = vpop.f32.mrf.mxu0 }
 0x16d   :  { %v812_v33 = vadd.f32 %v811_v14, %v772_v32  ;;  %v1315_v39 = vadd.f32 %v3653_v55, %v1307_v40 }
 0x16f   :  { %v3677_v36 = vmax.f32 %v1315_v39, 0.0 }
 0x170   :  { %1338 = vrot.lane.b32.xlu0 %v3657_v29, %s2674_s24 }
 0x171   :  { %1404 = vrot.lane.b32.xlu1 %v3677_v36, %s2673_s23  ;;  %1436 = vrot.lane.b32.xlu2 %v3677_v36, %s2670_s1 }
 0x172   :  { %v841_v7 = vpop.f32.mrf.mxu3 }
 0x173   :  { %v3681_v50 = vadd.f32 %v841_v7, %v812_v33  ;;  %v925_v8 = vpop.f32.mrf.mxu1 }
 0x174   :  { %v926_v61 = vadd.f32 %v925_v8, %v871_v23 }
 0x175   :  { %4716 = vst [vmem:[#allocation21_spill] sm:$0xff] %v3681_v50  ;;  %v961_v22 = vpop.f32.mrf.mxu2  ;;  %v4731_v50 = vld [vmem:[#allocation26_spill] sm:$0xff] }
 0x176   :  { %v879_v12 = vpop.f32.mrf.mxu0  ;;  %v962_v34 = vadd.f32 %v961_v22, %v926_v61 }
 0x178   :  { %1388 = vrot.lane.b32.xlu0 %v3677_v36, %s2669_s0 }
 0x179   :  { %1372 = vrot.lane.b32.xlu1 %v3677_v36, %s2672_s22  ;;  %1420 = vrot.lane.b32.xlu2 %v3677_v36, %s2671_s21 }
 0x17b   :  { %v994_v48 = vpop.f32.mrf.mxu3 }
 0x17c   :  { %v929_v24 = vpop.f32.mrf.mxu1  ;;  %v995_v43 = vadd.f32 %v994_v48, %v962_v34 }
 0x17d   :  { %v930_v18 = vadd.f32 %v929_v24, %v879_v12 }
 0x17e   :  { %v1036_v62 = vpop.f32.mrf.mxu0 }
 0x17f   :  { %v1037_v31 = vadd.f32 %v1036_v62, %v995_v43  ;;  %v4722_v62 = vld [vmem:[#allocation12_spill] sm:$0xff] }
 0x180   :  { %v966_v5 = vpop.f32.mrf.mxu2  ;;  %1450 = vrot.lane.b32.xlu0 %v3693_v47, %s2680_s27 }
 0x181   :  { %v967_v38 = vadd.f32 %v966_v5, %v930_v18 }
 0x183   :  { %v1000_v28 = vpop.f32.mrf.mxu3 }
 0x184   :  { %v1001_v3 = vadd.f32 %v1000_v28, %v967_v38  ;;  %v1066_v37 = vpop.f32.mrf.mxu1 }
 0x185   :  { %v1067_v2 = vadd.f32 %v1066_v37, %v1037_v31 }
 0x186   :  { %v1040_v57 = vpop.f32.mrf.mxu0 }
 0x187   :  { %v1308_v20 = vmul.f32 %v3651_v6, %v1067_v2  ;;  %v1041_v15 = vadd.f32 %v1040_v57, %v1001_v3  ;;  %v4724_v57 = vld [vmem:[#allocation13_spill] sm:$0xff] }
 0x188   :  { %v1100_v46 = vpop.f32.mrf.mxu2 }
 0x189   :  { %v1316_v49 = vadd.f32 %v3653_v55, %v1308_v20 }
 0x18b   :  { %v3698_v60 = vmax.f32 %v1316_v49, 0.0  ;;  %v1154_v16 = vpop.f32.mrf.mxu3 }
 0x18c   :  { %v1070_v4 = vpop.f32.mrf.mxu1  ;;  %v1155_v27 = vadd.f32 %v1154_v16, %v1100_v46 }
 0x18d   :  { %v3700_v44 = vadd.f32 %v1070_v4, %v1041_v15  ;;  %1422 = vrot.lane.b32.xlu2 %v3698_v60, %s2671_s21  ;;  %1438 = vrot.lane.b32.xlu1 %v3698_v60, %s2670_s1 }
 0x18e   :  { %v1190_v32 = vpop.f32.mrf.mxu0 }
 0x18f   :  { %4718 = vst [vmem:[#allocation36_spill] sm:$0xff] %v3700_v44  ;;  %v1191_v54 = vadd.f32 %v1190_v32, %v1155_v27 }
 0x190   :  { %v1108_v13 = vpop.f32.mrf.mxu2 }
 0x193   :  { %v1158_v53 = vpop.f32.mrf.mxu3 }
 0x194   :  { %v3706_v14 = vadd.f32 %v1158_v53, %v1108_v13  ;;  %v1223_v23 = vpop.f32.mrf.mxu1 }
 0x195   :  { %1406 = vrot.lane.b32.xlu2 %v3698_v60, %s2673_s23  ;;  %v1224_v40 = vadd.f32 %v1223_v23, %v1191_v54 }
 0x196   :  { %4719 = vst [vmem:[#allocation37_spill] sm:$0xff] %v3706_v14  ;;  %v4730_v14 = vld [vmem:[#allocation16_spill] sm:$0xff] }
 0x198   :  { %v1265_v33 = vpop.f32.mrf.mxu2 }
 0x199   :  { %v1266_v39 = vadd.f32 %v1265_v33, %v1224_v40  ;;  %v4725_v40 = vld [vmem:[#allocation14_spill] sm:$0xff] }
 0x19b   :  { %v1295_v7 = vpop.f32.mrf.mxu3 }
 0x19c   :  { %v1296_v8 = vadd.f32 %v1295_v7, %v1266_v39  ;;  %v3807_v7 = vand.u32 4294901760, %v3657_v29 }
 0x19d   :  { %1390 = vrot.lane.b32.xlu2 %v3698_v60, %s2669_s0 }
 0x19e   :  { %v1309_v12 = vmul.f32 %v3651_v6, %v1296_v8 }
 0x1a0   :  { %v1317_v22 = vadd.f32 %v3653_v55, %v1309_v12 }
 0x1a2   :  { %v3714_v61 = vmax.f32 %v1317_v22, 0.0 }
 0x1a4   :  { %4720 = vst [vmem:[#allocation38_spill] sm:$0xff] %v3714_v61  ;;  %1328 = vrot.lane.b32.xlu0 %v3714_v61, %s2676_s26  ;;  %1376 = vrot.lane.b32.xlu1 %v3714_v61, %s2672_s22 }
 0x1a5   :  { %1356 = vrot.lane.b32.xlu2 %v3677_v36, %s2675_s25 }
 0x1ac   :  { %1440 = vrot.lane.b32.xlu0 %v3714_v61, %s2670_s1  ;;  %1360 = vrot.lane.b32.xlu1 %v3714_v61, %s2675_s25 }
 0x1ad   :  { %1324 = vrot.lane.b32.xlu2 %v3677_v36, %s2676_s26 }
 0x1b2   :  { %v3734_v6 = vpop.permute.xlu2 %1386 }
 0x1b3   :  { %4721 = vst [vmem:[#allocation39_spill] sm:$0xff] %v3734_v6 }
 0x1b4   :  { %1392 = vrot.lane.b32.xlu0 %v3714_v61, %s2669_s0  ;;  %1344 = vrot.lane.b32.xlu1 %v3714_v61, %s2674_s24 }
 0x1b5   :  { %1408 = vrot.lane.b32.xlu2 %v3714_v61, %s2673_s23 }
 0x1ba   :  { %v3742_v55 = vpop.permute.xlu2 %1322 }
 0x1bc   :  { %1342 = vrot.lane.b32.xlu0 %v3698_v60, %s2674_s24  ;;  %1340 = vrot.lane.b32.xlu1 %v3677_v36, %s2674_s24 }
 0x1bd   :  { %1358 = vrot.lane.b32.xlu2 %v3698_v60, %s2675_s25 }
 0x1c4   :  { %1424 = vrot.lane.b32.xlu1 %v3714_v61, %s2671_s21 }
 0x1ca   :  { %v3746_v48 = vpop.permute.xlu0 %1402 }
 0x1cb   :  { %v3748_v24 = vpop.permute.xlu1 %1434  ;;  %v3752_v34 = vpop.permute.xlu2 %1436 }
 0x1cc   :  { %1374 = vrot.lane.b32.xlu1 %v3698_v60, %s2672_s22  ;;  %v1444_v18 = vsel %vm301_vm4, %v3748_v24, %v3752_v34 }
 0x1cd   :  { %v1446_v43 = vmul.f32 %v4722_v62, %v1444_v18  ;;  %v4727_v18 = vld [vmem:[#allocation11_spill] sm:$0xff] }
 0x1cf   :  { %v3759_v5 = vand.u32 4294901760, %v1446_v43 }
 0x1d1   :  { %v3762_v38 = vsub.f32 %v1446_v43, %v3759_v5  ;;  %1463 = vmatpush.msra.mxu0 %v3759_v5  ;;  %1603 = vmatpush.msra.mxu3 %v3759_v5 }
 0x1d2   :  { %v3766_v31 = vpop.permute.xlu0 %1370 }
 0x1d3   :  { %v3768_v28 = vpop.permute.xlu1 %1418  ;;  %v4603_v3 = vand.u32 4294901760, %v3762_v38  ;;  %v3773_v37 = vpop.permute.xlu2 %1420  ;;  %1564 = vmatpush.msra.mxu2 %v3762_v38 }
 0x1d4   :  { %4723 = vst [vmem:[#allocation12_spill] sm:$0xff] %v3768_v28  ;;  %1326 = vrot.lane.b32.xlu1 %v3698_v60, %s2676_s26  ;;  %v1428_v2 = vsel %vm284_vm5, %v3768_v28, %v3773_v37  ;;  %v4750_v28 = vand.u32 4294901760, %v3762_v38 }
 0x1d5   :  { %v1430_v20 = vmul.f32 %v4724_v57, %v1428_v2  ;;  %v1499_v15 = vsub.f32 %v3762_v38, %v4603_v3  ;;  %v3822_v2 = vsub.f32 %v3657_v29, %v3807_v7 }
 0x1d7   :  { %v3784_v46 = vand.u32 4294901760, %v1430_v20  ;;  %v1500_v49 = vand.u32 4294901760, %v1499_v15 }
 0x1d9   :  { %1465 = vmatpush.msra.mxu0 %v3784_v46  ;;  %1501 = vmatpush.msra.mxu1 %v1500_v49  ;;  %v3790_v4 = vsub.f32 %v1430_v20, %v3784_v46 }
 0x1da   :  { %v3787_v16 = vpop.permute.xlu0 %1354  ;;  %1605 = vmatpush.msra.mxu3 %v3784_v46 }
 0x1db   :  { %1567 = vmatpush.msra.mxu2 %v3790_v4  ;;  %v4602_v13 = vand.u32 4294901760, %v3790_v4  ;;  %v4753_v38 = vand.u32 4294901760, %v3790_v4 }
 0x1dd   :  { %v1505_v27 = vsub.f32 %v3790_v4, %v4602_v13 }
 0x1df   :  { %v1506_v32 = vand.u32 4294901760, %v1505_v27  ;;  %v4601_v27 = vand.u32 4294901760, %v3822_v2 }
 0x1e1   :  { %1507 = vmatpush.msra.mxu1 %v1506_v32 }
 0x1e2   :  { %v3798_v53 = vpop.permute.xlu0 %1338 }
 0x1e3   :  { %v1405_v54 = vpop.permute.xlu1 %1404 }
 0x1e4   :  { %v1412_v23 = vsel %vm267_vm9, %v3746_v48, %v1405_v54 }
 0x1e5   :  { %v1414_v33 = vmul.f32 %v4725_v40, %v1412_v23  ;;  %v1523_v23 = vsub.f32 %v3822_v2, %v4601_v27 }
 0x1e7   :  { %v3804_v39 = vand.u32 4294901760, %v1414_v33 }
 0x1e9   :  { %1467 = vmatpush.msra.mxu0 %v3804_v39  ;;  %1607 = vmatpush.msra.mxu3 %v3804_v39  ;;  %v3812_v12 = vsub.f32 %v1414_v33, %v3804_v39  ;;  %v1524_v33 = vand.u32 4294901760, %v1523_v23 }
 0x1ea   :  { %v1389_v8 = vpop.permute.xlu0 %1388 }
 0x1eb   :  { %v1396_v22 = vsel %vm4726_vm6, %v3734_v6, %v1389_v8  ;;  %1570 = vmatpush.msra.mxu2 %v3812_v12  ;;  %v4600_v43 = vand.u32 4294901760, %v3812_v12  ;;  %v4755_v4 = vand.u32 4294901760, %v3812_v12 }
 0x1ec   :  { %v1398_v62 = vmul.f32 %v4727_v18, %v1396_v22  ;;  %v3846_v22 = vpop.permute.xlu2 %1422  ;;  %v3848_v18 = vpop.permute.xlu1 %1372 }
 0x1ed   :  { %v1511_v20 = vsub.f32 %v3812_v12, %v4600_v43  ;;  %v1427_v27 = vsel %vm284_vm5, %v3773_v37, %v3846_v22 }
 0x1ee   :  { %v3824_v57 = vand.u32 4294901760, %v1398_v62  ;;  %v1431_v26 = vmul.f32 %v4731_v50, %v1427_v27 }
 0x1ef   :  { %v1512_v15 = vand.u32 4294901760, %v1511_v20 }
 0x1f0   :  { %1469 = vmatpush.msra.mxu0 %v3824_v57  ;;  %1609 = vmatpush.msra.mxu3 %v3824_v57  ;;  %v3832_v49 = vsub.f32 %v1398_v62, %v3824_v57 }
 0x1f1   :  { %1513 = vmatpush.msra.mxu1 %v1512_v15 }
 0x1f2   :  { %1471 = vmatpush.msra.mxu0 %v3807_v7  ;;  %v4599_v29 = vand.u32 4294901760, %v3832_v49  ;;  %1573 = vmatpush.msra.mxu2 %v3832_v49 }
 0x1f3   :  { %1611 = vmatpush.msra.mxu3 %v3807_v7 }
 0x1f4   :  { %v1517_v32 = vsub.f32 %v3832_v49, %v4599_v29  ;;  %1576 = vmatpush.msra.mxu2 %v3822_v2  ;;  %v3850_v62 = vpop.permute.xlu2 %1406  ;;  %v1451_v29 = vpop.permute.xlu0 %1450 }
 0x1f5   :  { %v1453_v13 = vsel %vm1452_vm8, %v1451_v29, 0  ;;  %v1411_v17 = vsel %vm267_vm9, %v1405_v54, %v3850_v62 }
 0x1f6   :  { %v1518_v40 = vand.u32 4294901760, %v1517_v32  ;;  %v3887_v29 = vand.u32 4294901760, %v1453_v13  ;;  %v1415_v27 = vmul.f32 %v3092_v51, %v1411_v17 }
 0x1f8   :  { %1519 = vmatpush.msra.mxu1 %v1518_v40  ;;  %v4729_v40 = vld [vmem:[#allocation19_spill] sm:$0xff]  ;;  %v3912_v51 = vsub.f32 %v1453_v13, %v3887_v29  ;;  %v3920_v47 = vand.u32 4294901760, %v1415_v27 }
 0x1fa   :  { %1525 = vmatpush.msra.mxu1 %v1524_v33 }
 0x1fc   :  { %v3854_v15 = vpop.permute.xlu2 %1390 }
 0x1fd   :  { %v1395_v50 = vsel %vm4734_vm10, %v1389_v8, %v3854_v15 }
 0x1fe   :  { %v1399_v54 = vmul.f32 %v3089_v0, %v1395_v50 }
 0x1ff   :  { %v3852_v20 = vpop.permute.xlu1 %1438 }
 0x200   :  { %v1443_v23 = vsel %vm301_vm4, %v3752_v34, %v3852_v20 }
 0x201   :  { %v1447_v44 = vmul.f32 %v4730_v14, %v1443_v23 }
 0x204   :  { %v3878_v19 = vpop.permute.xlu2 %1356 }
 0x205   :  { %4732 = vst [vmem:[#allocation14_spill] sm:$0xff] %v3878_v19 }
 0x216   :  { %v3856_v43 = vpop.permute.xlu1 %1376  ;;  %v3880_v34 = vpop.permute.xlu0 %1328 }
 0x217   :  { %4728 = vst [vmem:[#allocation13_spill] sm:$0xff] %v3856_v43  ;;  %v1381_v32 = vsel %vm233_vm14, %v3856_v43, %v3766_v31  ;;  %v1333_v23 = vsel %vm4736_vm7, %v3880_v34, %v3742_v55  ;;  %v4740_v43 = vld [vmem:[#allocation24_spill] sm:$0xff] }
 0x218   :  { %v1382_v33 = vmul.f32 %v4729_v40, %v1381_v32  ;;  %4733 = vst [vmem:[#allocation11_spill] sm:$0xff] %v3880_v34  ;;  %v3897_v32 = vand.u32 4294901760, %v1447_v44  ;;  %v3907_v40 = vand.u32 4294901760, %v1431_v26  ;;  %v1334_v34 = vmul.f32 %v4740_v43, %v1333_v23 }
 0x219   :  { %v3934_v43 = vand.u32 4294901760, %v1399_v54  ;;  %v1364_v23 = vsel %vm4741_vm2, %v3787_v16, %v3878_v19 }
 0x21a   :  { %v3871_v3 = vand.u32 4294901760, %v1382_v33  ;;  %v3927_v0 = vsub.f32 %v1447_v44, %v3897_v32  ;;  %v3930_v50 = vsub.f32 %v1431_v26, %v3907_v40  ;;  %v3947_v44 = vpop.permute.xlu2 %1324 }
 0x21b   :  { %4742 = vst [vmem:[#allocation16_spill] sm:$0xff] %v3947_v44  ;;  %v1332_v1 = vsel %vm4745_vm15, %v3742_v55, %v3947_v44 }
 0x21c   :  { %1473 = vmatpush.msra.mxu0 %v3871_v3  ;;  %1613 = vmatpush.msra.mxu3 %v3871_v3  ;;  %v3885_v37 = vsub.f32 %v1382_v33, %v3871_v3  ;;  %v4738_v33 = vld [vmem:[#allocation22_spill] sm:$0xff]  ;;  %v4746_v58 = vand.u32 4294901760, %v3927_v0 }
 0x21e   :  { %1579 = vmatpush.msra.mxu2 %v3885_v37  ;;  %v3893_v14 = vpop.permute.xlu1 %1360  ;;  %v4739_v17 = vand.u32 4294901760, %v3885_v37  ;;  %v1749_v6 = vsub.f32 %v3927_v0, %v4746_v58  ;;  %v4747_v58 = vand.u32 4294901760, %v3930_v50 }
 0x21f   :  { %4735 = vst [vmem:[#allocation19_spill] sm:$0xff] %v3893_v14  ;;  %v1365_v8 = vsel %vm4737_vm11, %v3893_v14, %v3787_v16  ;;  %v3954_v14 = vsub.f32 %v1415_v27, %v3920_v47  ;;  %v3967_v27 = vand.u32 4294901760, %v3677_v36  ;;  %v3970_v16 = vsub.f32 %v1399_v54, %v3934_v43 }
 0x220   :  { %v1366_v61 = vmul.f32 %v4738_v33, %v1365_v8  ;;  %v1529_v35 = vsub.f32 %v3885_v37, %v4739_v17  ;;  %v1380_v8 = vsel %vm233_vm14, %v3766_v31, %v3848_v18  ;;  %v3941_v31 = vand.u32 4294901760, %v3912_v51 }
 0x221   :  { %v1383_v26 = vmul.f32 %v3104_v42, %v1380_v8  ;;  %v3949_v33 = vand.u32 4294901760, %v1334_v34  ;;  %v1367_v8 = vmul.f32 %v3176_v63, %v1364_v23  ;;  %v1755_v55 = vsub.f32 %v3930_v50, %v4747_v58 }
 0x222   :  { %v3918_v30 = vand.u32 4294901760, %v1366_v61  ;;  %v1530_v13 = vand.u32 4294901760, %v1529_v35  ;;  %v1483_v63 = vsub.f32 %v3912_v51, %v3941_v31  ;;  %v4749_v58 = vand.u32 4294901760, %v3954_v14 }
 0x223   :  { %v3981_v23 = vand.u32 4294901760, %v1383_v26  ;;  %v3992_v44 = vand.u32 4294901760, %v1367_v8 }
 0x224   :  { %1475 = vmatpush.msra.mxu0 %v3918_v30  ;;  %1615 = vmatpush.msra.mxu3 %v3918_v30  ;;  %v3944_v35 = vsub.f32 %v1366_v61, %v3918_v30 }
 0x225   :  { %1531 = vmatpush.msra.mxu1 %v1530_v13  ;;  %v4744_v13 = vld [vmem:[#allocation23_spill] sm:$0xff]  ;;  %v4029_v19 = vsub.f32 %v1367_v8, %v3992_v44 }
 0x226   :  { %v3951_v17 = vpop.permute.xlu1 %1344  ;;  %1582 = vmatpush.msra.mxu2 %v3944_v35  ;;  %v4621_v42 = vand.u32 4294901760, %v3944_v35 }
 0x227   :  { %4743 = vst [vmem:[#allocation26_spill] sm:$0xff] %v3951_v17  ;;  %v1349_v61 = vsel %vm199_vm0, %v3951_v17, %v3798_v53 }
 0x228   :  { %v1350_v52 = vmul.f32 %v4744_v13, %v1349_v61  ;;  %v1535_v17 = vsub.f32 %v3944_v35, %v4621_v42  ;;  %v3986_v13 = vsub.f32 %v1334_v34, %v3949_v33  ;;  %v1335_v42 = vmul.f32 %v3193_v10, %v1332_v1 }
 0x229   :  { %v4002_v34 = vsub.f32 %v3677_v36, %v3967_v27  ;;  %v4011_v1 = vsub.f32 %v1383_v26, %v3981_v23  ;;  %v1750_v26 = vand.u32 4294901760, %v1749_v6  ;;  %v1761_v10 = vsub.f32 %v3954_v14, %v4749_v58 }
 0x22a   :  { %v3983_v61 = vand.u32 4294901760, %v1350_v52  ;;  %v1536_v54 = vand.u32 4294901760, %v1535_v17  ;;  %v4004_v17 = vand.u32 4294901760, %v1483_v63  ;;  %v4031_v36 = vand.u32 4294901760, %v1335_v42 }
 0x22b   :  { %v1756_v6 = vand.u32 4294901760, %v1755_v55  ;;  %v1784_v55 = vand.u32 4294901760, %v4029_v19 }
 0x22c   :  { %1477 = vmatpush.msra.mxu0 %v3983_v61  ;;  %1617 = vmatpush.msra.mxu3 %v3983_v61  ;;  %v3998_v21 = vsub.f32 %v1350_v52, %v3983_v61 }
 0x22d   :  { %1537 = vmatpush.msra.mxu1 %v1536_v54 }
 0x22e   :  { %1479 = vmatpush.msra.mxu0 %v3949_v33  ;;  %1585 = vmatpush.msra.mxu2 %v3998_v21  ;;  %v4015_v52 = vpop.permute.xlu1 %1340  ;;  %v4751_v58 = vand.u32 4294901760, %v3998_v21 }
 0x22f   :  { %4748 = vst [vmem:[#allocation22_spill] sm:$0xff] %v4015_v52  ;;  %1619 = vmatpush.msra.mxu3 %v3949_v33  ;;  %v1348_v54 = vsel %vm199_vm0, %v3798_v53, %v4015_v52  ;;  %1485 = vmatmul.f32.vlgmr.msra.gmra.mxu0 %v4004_v17  ;;  %v4752_v52 = vand.u32 4294901760, %v3970_v16 }
 0x230   :  { %v1351_v63 = vmul.f32 %v3173_v45, %v1348_v54  ;;  %1623 = vmatmul.f32.vlgmr.msra.gmra.mxu3 %v3941_v31  ;;  %1637 = vmatpush.msrb.mxu0 %v4750_v28  ;;  %v1541_v8 = vsub.f32 %v3998_v21, %v4751_v58  ;;  %v4754_v28 = vand.u32 4294901760, %v3986_v13 }
 0x231   :  { %1751 = vmatpush.msrb.mxu3 %v1750_v26  ;;  %1588 = vmatpush.msra.mxu2 %v3986_v13  ;;  %v1767_v11 = vsub.f32 %v3970_v16, %v4752_v52  ;;  %v1762_v26 = vand.u32 4294901760, %v1761_v10  ;;  %v4056_v52 = vsub.f32 %v1335_v42, %v4031_v36  ;;  %v4757_v42 = vand.u32 4294901760, %v3832_v49 }
 0x232   :  { %v4045_v45 = vand.u32 4294901760, %v1351_v63  ;;  %1591 = vmatmul.f32.vlgmr.msra.gmra.mxu2 %v3912_v51  ;;  %1641 = vmatpush.msrb.mxu0 %v4753_v38  ;;  %v1547_v54 = vsub.f32 %v3986_v13, %v4754_v28  ;;  %v1542_v58 = vand.u32 4294901760, %v1541_v8  ;;  %v4756_v38 = vand.u32 4294901760, %v4002_v34 }
 0x233   :  { %1713 = vmatpush.msrb.mxu2 %v3897_v32  ;;  %1757 = vmatpush.msrb.mxu3 %v1756_v6  ;;  %v1768_v10 = vand.u32 4294901760, %v1767_v11  ;;  %v1785_v11 = vsub.f32 %v4029_v19, %v1784_v55 }
 0x234   :  { %v4059_v53 = vsub.f32 %v1351_v63, %v4045_v45  ;;  %1645 = vmatpush.msrb.mxu0 %v4755_v4  ;;  %v1773_v28 = vsub.f32 %v4002_v34, %v4756_v38  ;;  %1543 = vmatpush.msra.mxu1 %v1542_v58  ;;  %v1548_v6 = vand.u32 4294901760, %v1547_v54  ;;  %v4758_v63 = vand.u32 4294901760, %v4011_v1 }
 0x235   :  { %1715 = vmatpush.msrb.mxu2 %v3907_v40  ;;  %1763 = vmatpush.msrb.mxu3 %v1762_v26  ;;  %v4759_v4 = vand.u32 4294901760, %v3822_v2  ;;  %v1796_v54 = vand.u32 4294901760, %v4056_v52  ;;  %v4760_v58 = vand.u32 4294901760, %v3885_v37  ;;  %v1786_v38 = vand.u32 4294901760, %v1785_v11  ;;  %v4776_v11 = vld [vmem:[#allocation39_spill] sm:$0xff] }
 0x236   :  { %1649 = vmatpush.msrb.mxu0 %v4757_v42  ;;  %v1779_v12 = vsub.f32 %v4011_v1, %v4758_v63  ;;  %v1790_v8 = vand.u32 4294901760, %v4059_v53  ;;  %1549 = vmatpush.msra.mxu1 %v1548_v6  ;;  %v1774_v26 = vand.u32 4294901760, %v1773_v28  ;;  %v4761_v42 = vand.u32 4294901760, %v3944_v35  ;;  %v1441_v35 = vpop.permute.xlu0 %1440 }
 0x237   :  { %1717 = vmatpush.msrb.mxu2 %v3920_v47  ;;  %1769 = vmatpush.msrb.mxu3 %v1768_v10  ;;  %v1797_v10 = vsub.f32 %v4056_v52, %v1796_v54  ;;  %v4763_v37 = vand.u32 4294901760, %v3986_v13 }
 0x238   :  { %1653 = vmatpush.msrb.mxu0 %v4759_v4  ;;  %v1791_v49 = vsub.f32 %v4059_v53, %v1790_v8  ;;  %1551 = vmatmul.f32.vlgmr.msra.gmra.mxu1 %v3887_v29  ;;  %v1780_v2 = vand.u32 4294901760, %v1779_v12 }
 0x239   :  { %1719 = vmatpush.msrb.mxu2 %v3934_v43  ;;  %1683 = vmatpush.msrb.mxu1 %v3759_v5  ;;  %v4762_v5 = vand.u32 4294901760, %v3998_v21  ;;  %v1425_v21 = vpop.permute.xlu1 %1424 }
 0x23a   :  { %1775 = vmatpush.msrb.mxu3 %v1774_v26  ;;  %1657 = vmatpush.msrb.mxu0 %v4760_v58  ;;  %v1792_v28 = vand.u32 4294901760, %v1791_v49 }
 0x23b   :  { %1721 = vmatpush.msrb.mxu2 %v3967_v27  ;;  %1685 = vmatpush.msrb.mxu1 %v3784_v46  ;;  %v1798_v46 = vand.u32 4294901760, %v1797_v10 }
 0x23c   :  { %1781 = vmatpush.msrb.mxu3 %v1780_v2  ;;  %1661 = vmatpush.msrb.mxu0 %v4761_v42  ;;  %v4780_v42 = vld [vmem:[#allocation34_spill] sm:$0xff] }
 0x23d   :  { %1723 = vmatpush.msrb.mxu2 %v3981_v23  ;;  %1687 = vmatpush.msrb.mxu1 %v3804_v39  ;;  %v4764_v39 = vand.u32 4294901760, %v3927_v0 }
 0x23e   :  { %1787 = vmatpush.msrb.mxu3 %v1786_v38  ;;  %1665 = vmatpush.msrb.mxu0 %v4762_v5  ;;  %v4779_v38 = vld [vmem:[#allocation30_spill] sm:$0xff] }
 0x23f   :  { %1725 = vmatpush.msrb.mxu2 %v3992_v44  ;;  %1689 = vmatpush.msrb.mxu1 %v3824_v57  ;;  %v1409_v57 = vpop.permute.xlu2 %1408 }
 0x240   :  { %1793 = vmatpush.msrb.mxu3 %v1792_v28  ;;  %1669 = vmatpush.msrb.mxu0 %v4763_v37 }
 0x241   :  { %1727 = vmatpush.msrb.mxu2 %v4045_v45  ;;  %1691 = vmatpush.msrb.mxu1 %v3807_v7  ;;  %v4765_v7 = vand.u32 4294901760, %v3930_v50 }
 0x242   :  { %1799 = vmatpush.msrb.mxu3 %v1798_v46  ;;  %1671 = vmatmul.f32.vlgmr.msrb.gmra.mxu0 %v3887_v29  ;;  %v4781_v46 = vld [vmem:[#allocation15_spill] sm:$0xff] }
 0x243   :  { %1801 = vmatmul.f32.vlgmr.msrb.gmra.mxu3 %v3887_v29  ;;  %1814 = vmatpush.msra.mxu0 %v3927_v0  ;;  %v4766_v0 = vand.u32 4294901760, %v3954_v14 }
 0x244   :  { %1933 = vmatpush.msra.mxu3 %v3897_v32  ;;  %1693 = vmatpush.msrb.mxu1 %v3871_v3  ;;  %v1442_v3 = vsel %vm301_vm4, %v3852_v20, %v1441_v35 }
 0x245   :  { %1729 = vmatpush.msrb.mxu2 %v4031_v36  ;;  %1817 = vmatpush.msra.mxu0 %v3930_v50  ;;  %v1426_v50 = vsel %vm284_vm5, %v3846_v22, %v1425_v21  ;;  %v1448_v20 = vmul.f32 %v3251_v56, %v1442_v3  ;;  %v4769_v56 = vand.u32 4294901760, %v4002_v34 }
 0x246   :  { %1735 = vmatmul.f32.vlgmr.msrb.gmra.mxu2 %v4004_v17  ;;  %1935 = vmatpush.msra.mxu3 %v3907_v40 }
 0x247   :  { %1887 = vmatpush.msra.mxu2 %v4764_v39  ;;  %1695 = vmatpush.msrb.mxu1 %v3918_v30  ;;  %v1393_v30 = vpop.permute.xlu0 %1392 }
 0x248   :  { %1820 = vmatpush.msra.mxu0 %v3954_v14  ;;  %1937 = vmatpush.msra.mxu3 %v3920_v47  ;;  %v1410_v14 = vsel %vm267_vm9, %v3850_v62, %v1409_v57  ;;  %v1394_v22 = vsel %vm4768_vm1, %v3854_v15, %v1393_v30  ;;  %v4770_v15 = vmov %v4758_v63  ;;  %v4773_v63 = vld [vmem:[#allocation14_spill] sm:$0xff] }
 0x249   :  { %1891 = vmatpush.msra.mxu2 %v4765_v7  ;;  %1697 = vmatpush.msrb.mxu1 %v3983_v61  ;;  %v4767_v61 = vand.u32 4294901760, %v3970_v16  ;;  %v1416_v62 = vmul.f32 %v3366_v59, %v1410_v14  ;;  %v4786_v14 = vld [vmem:[#allocation35_spill] sm:$0xff] }
 0x24a   :  { %1823 = vmatpush.msra.mxu0 %v3970_v16  ;;  %1939 = vmatpush.msra.mxu3 %v3934_v43  ;;  %v4151_v16 = vpop.permute.xlu1 %1374 }
 0x24b   :  { %1895 = vmatpush.msra.mxu2 %v4766_v0  ;;  %1699 = vmatpush.msrb.mxu1 %v3949_v33  ;;  %v1432_v33 = vmul.f32 %v3289_v25, %v1426_v50  ;;  %v1400_v25 = vmul.f32 %v3132_v41, %v1394_v22  ;;  %v4171_v59 = vand.u32 4294901760, %v1416_v62  ;;  %v1445_v41 = vsel %vm301_vm4, %v1441_v35, %v3748_v24  ;;  %vm4774_vm4 = vmmov %vm4741_vm2  ;;  %v4785_v0 = vld [vmem:[#allocation31_spill] sm:$0xff] }
 0x24c   :  { %1826 = vmatpush.msra.mxu0 %v4002_v34  ;;  %1701 = vmatmul.f32.vlgmr.msrb.gmra.mxu1 %v3887_v29  ;;  %v4193_v24 = vand.u32 4294901760, %v3698_v60  ;;  %v2681_v50 = vmov 115  }
 0x24d   :  { %1899 = vmatpush.msra.mxu2 %v4767_v61  ;;  %1853 = vmatpush.msra.mxu1 %v3897_v32  ;;  %v4156_v32 = vand.u32 4294901760, %v1448_v20  ;;  %v4164_v13 = vand.u32 4294901760, %v1432_v33  ;;  %v4221_v26 = vsub.f32 %v1416_v62, %v4171_v59 }
 0x24e   :  { %1941 = vmatpush.msra.mxu3 %v3967_v27  ;;  %1829 = vmatpush.msra.mxu0 %v4011_v1  ;;  %v1413_v1 = vsel %vm267_vm9, %v1409_v57, %v3746_v48  ;;  %v4775_v48 = vld [vmem:[#allocation32_spill] sm:$0xff]  ;;  %vm4783_vm9 = vmmov %vm4710_vm3 }
 0x24f   :  { %1903 = vmatpush.msra.mxu2 %v4769_v56  ;;  %1855 = vmatpush.msra.mxu1 %v3907_v40  ;;  %v4184_v40 = vand.u32 4294901760, %v1400_v25  ;;  %v4198_v34 = vsub.f32 %v1432_v33, %v4164_v13  ;;  %v1417_v5 = vmul.f32 %v4780_v42, %v1413_v1  ;;  %v2010_v3 = vand.u32 4294901760, %v4221_v26 }
 0x250   :  { %1943 = vmatpush.msra.mxu3 %v3981_v23  ;;  %1832 = vmatpush.msra.mxu0 %v4029_v19  ;;  %v4182_v19 = vpop.permute.xlu2 %1358 }
 0x251   :  { %1907 = vmatpush.msra.mxu2 %v4770_v15  ;;  %1857 = vmatpush.msra.mxu1 %v3920_v47  ;;  %v4177_v47 = vsub.f32 %v1448_v20, %v4156_v32  ;;  %v1363_v12 = vsel %vm4774_vm4, %v4773_v63, %v4182_v19  ;;  %v4231_v58 = vsub.f32 %v1400_v25, %v4184_v40  ;;  %v2004_v10 = vand.u32 4294901760, %v4198_v34 }
 0x252   :  { %1945 = vmatpush.msra.mxu3 %v3992_v44  ;;  %1835 = vmatpush.msra.mxu0 %v4059_v53  ;;  %v4771_v53 = vld [vmem:[#allocation29_spill] sm:$0xff]  ;;  %v4226_v2 = vpop.permute.xlu1 %1326  ;;  %v1368_v37 = vmul.f32 %v4781_v46, %v1363_v12  ;;  %v4283_v25 = vand.u32 4294901760, %v1417_v5  ;;  %v4792_v46 = vld [vmem:[#allocation26_spill] sm:$0xff] }
 0x253   :  { %1911 = vmatpush.msra.mxu2 %v1784_v55  ;;  %1859 = vmatpush.msra.mxu1 %v3934_v43  ;;  %v1379_v43 = vsel %vm233_vm14, %v3848_v18, %v4151_v16  ;;  %v1449_v18 = vmul.f32 %v4771_v53, %v1445_v41  ;;  %v4204_v55 = vpop.permute.xlu0 %1342  ;;  %v2005_v22 = vsub.f32 %v4198_v34, %v2004_v10  ;;  %v2016_v33 = vand.u32 4294901760, %v4231_v58 }
 0x254   :  { %1947 = vmatpush.msra.mxu3 %v4045_v45  ;;  %1838 = vmatpush.msra.mxu0 %v4056_v52  ;;  %v1384_v4 = vmul.f32 %v4775_v48, %v1379_v43  ;;  %v4778_v52 = vld [vmem:[#allocation22_spill] sm:$0xff]  ;;  %v4275_v56 = vand.u32 4294901760, %v1368_v37  ;;  %v2011_v43 = vsub.f32 %v4221_v26, %v2010_v3 }
 0x255   :  { %1915 = vmatpush.msra.mxu2 %v1790_v8  ;;  %1861 = vmatpush.msra.mxu1 %v3967_v27  ;;  %v4772_v27 = vld [vmem:[#allocation12_spill] sm:$0xff]  ;;  %v1998_v8 = vand.u32 4294901760, %v4177_v47  ;;  %v4247_v35 = vand.u32 4294901760, %v1449_v18  ;;  %v2006_v12 = vand.u32 4294901760, %v2005_v22  ;;  %v2017_v48 = vsub.f32 %v4231_v58, %v2016_v33 }
 0x256   :  { %1949 = vmatpush.msra.mxu3 %v4031_v36  ;;  %1841 = vmatmul.f32.vlgmr.msra.gmra.mxu0 %v3912_v51  ;;  %v1429_v6 = vsel %vm284_vm5, %v1425_v21, %v4772_v27  ;;  %vm4777_vm5 = vmmov %vm4768_vm1  ;;  %v4782_v21 = vld [vmem:[#allocation16_spill] sm:$0xff]  ;;  %v4788_v27 = vld [vmem:[#allocation13_spill] sm:$0xff]  ;;  %v2012_v42 = vand.u32 4294901760, %v2011_v43 }
 0x257   :  { %1951 = vmatmul.f32.vlgmr.msra.gmra.mxu3 %v3887_v29  ;;  %1963 = vmatpush.msrb.mxu0 %v4156_v32  ;;  %v1397_v49 = vsel %vm4777_vm5, %v1393_v30, %v4776_v11  ;;  %v1433_v28 = vmul.f32 %v4779_v38, %v1429_v6  ;;  %v1331_v39 = vsel %vm4783_vm9, %v4782_v21, %v4226_v2  ;;  %v4791_v38 = vld [vmem:[#allocation33_spill] sm:$0xff] }
 0x258   :  { %2103 = vmatpush.msrb.mxu3 %v4156_v32  ;;  %1863 = vmatpush.msra.mxu1 %v3981_v23  ;;  %v4235_v23 = vsub.f32 %v3698_v60, %v4193_v24  ;;  %v4251_v60 = vand.u32 4294901760, %v1384_v4  ;;  %v1999_v7 = vsub.f32 %v4177_v47, %v1998_v8  ;;  %v4278_v62 = vsub.f32 %v1449_v18, %v4247_v35 }
 0x259   :  { %1919 = vmatpush.msra.mxu2 %v1796_v54  ;;  %1965 = vmatpush.msrb.mxu0 %v4164_v13  ;;  %v1347_v54 = vsel %vm199_vm0, %v4778_v52, %v4204_v55  ;;  %v4267_v61 = vand.u32 4294901760, %v1433_v28  ;;  %v1378_v6 = vsel %vm233_vm14, %v4151_v16, %v4788_v27  ;;  %vm4790_vm14 = vmmov %vm4741_vm2  ;;  %v4323_v52 = vsub.f32 %v1368_v37, %v4275_v56  ;;  %v4797_v27 = vld [vmem:[#allocation28_spill] sm:$0xff] }
 0x25a   :  { %1921 = vmatmul.f32.vlgmr.msra.gmra.mxu2 %v3887_v29  ;;  %2105 = vmatpush.msrb.mxu3 %v4164_v13  ;;  %v1352_v30 = vmul.f32 %v4785_v0, %v1347_v54  ;;  %v2022_v20 = vand.u32 4294901760, %v4235_v23  ;;  %v2000_v41 = vand.u32 4294901760, %v1999_v7  ;;  %v4291_v1 = vsub.f32 %v1384_v4, %v4251_v60  ;;  %v4789_v4 = vld [vmem:[#allocation19_spill] sm:$0xff]  ;;  %v4793_v7 = vld [vmem:[#allocation38_spill] sm:$0xff]  ;;  %v4794_v0 = vld [vmem:[#allocation20_spill] sm:$0xff] }
 0x25b   :  { %2064 = vmatpush.msrb.mxu2 %v4177_v47  ;;  %1865 = vmatpush.msra.mxu1 %v3992_v44  ;;  %v4784_v44 = vld [vmem:[#allocation27_spill] sm:$0xff]  ;;  %v4307_v63 = vsub.f32 %v1433_v28, %v4267_v61  ;;  %v2248_v16 = vand.u32 4294901760, %v4278_v62  ;;  %v1362_v11 = vsel %vm4790_vm14, %v4182_v19, %v4789_v4  ;;  %v4326_v54 = vsub.f32 %v1417_v5, %v4283_v25  ;;  %v4798_v4 = vld [vmem:[#allocation17_spill] sm:$0xff] }
 0x25c   :  { %1967 = vmatpush.msrb.mxu0 %v4171_v59  ;;  %2107 = vmatpush.msrb.mxu3 %v4171_v59  ;;  %v1401_v57 = vmul.f32 %v4784_v44, %v1397_v49  ;;  %v4295_v18 = vand.u32 4294901760, %v1352_v30  ;;  %v1385_v28 = vmul.f32 %v4791_v38, %v1378_v6  ;;  %v2028_v19 = vand.u32 4294901760, %v4291_v1 }
 0x25d   :  { %2067 = vmatpush.msrb.mxu2 %v4198_v34  ;;  %2581 = vset.pattern.permute.xlu0 %v2681_v50  ;;  %v1346_v21 = vsel %vm199_vm0, %v4204_v55, %v4792_v46  ;;  %v4340_v44 = vand.u32 4294901760, %v4793_v7  ;;  %v1369_v50 = vmul.f32 %v4794_v0, %v1362_v11  ;;  %v2018_v55 = vand.u32 4294901760, %v2017_v48  ;;  %vm4796_vm0 = vmmov %vm4710_vm3 }
 0x25e   :  { %1867 = vmatpush.msra.mxu1 %v4045_v45  ;;  %2464 = vperm.xlu0 %2581, %v4786_v14   ;;  %v4787_v45 = vld [vmem:[#allocation18_spill] sm:$0xff]  ;;  %v4293_v53 = vand.u32 4294901760, %v1401_v57  ;;  %v4337_v5 = vsub.f32 %v1352_v30, %v4295_v18  ;;  %v1353_v6 = vmul.f32 %v4797_v27, %v1346_v21  ;;  %v2029_v9 = vsub.f32 %v4291_v1, %v2028_v19 }
 0x25f   :  { %1969 = vmatpush.msrb.mxu0 %v4184_v40  ;;  %v1336_v15 = vmul.f32 %v4787_v45, %v1331_v39  ;;  %2070 = vmatpush.msrb.mxu2 %v4221_v26  ;;  %v2682_v39 = vmov 116   ;;  %v2254_v45 = vand.u32 4294901760, %v4307_v63  ;;  %v4376_v48 = vand.u32 4294901760, %v1369_v50 }
 0x260   :  { %2109 = vmatpush.msrb.mxu3 %v4184_v40  ;;  %1869 = vmatpush.msra.mxu1 %v4031_v36  ;;  %v2023_v36 = vsub.f32 %v4235_v23, %v2022_v20  ;;  %v4344_v22 = vsub.f32 %v1401_v57, %v4293_v53  ;;  %v2249_v57 = vsub.f32 %v4278_v62, %v2248_v16  ;;  %v2030_v0 = vand.u32 4294901760, %v2029_v9 }
 0x261   :  { %1971 = vmatpush.msrb.mxu0 %v4193_v24  ;;  %1873 = vmatmul.f32.vlgmr.msra.gmra.mxu1 %v3941_v31  ;;  %v4318_v49 = vand.u32 4294901760, %v1336_v15  ;;  %v2255_v38 = vsub.f32 %v4307_v63, %v2254_v45 }
 0x262   :  { %2073 = vmatpush.msrb.mxu2 %v4231_v58  ;;  %2001 = vmatpush.msrb.mxu1 %v2000_v41  ;;  %v2024_v37 = vand.u32 4294901760, %v2023_v36  ;;  %v4795_v41 = vld [vmem:[#allocation11_spill] sm:$0xff]  ;;  %v4362_v36 = vand.u32 4294901760, %v1385_v28  ;;  %v2250_v46 = vand.u32 4294901760, %v2249_v57 }
 0x263   :  { %2111 = vmatpush.msrb.mxu3 %v4193_v24  ;;  %1973 = vmatpush.msrb.mxu0 %v4251_v60  ;;  %v1330_v30 = vsel %vm4796_vm0, %v4226_v2, %v4795_v41  ;;  %v4358_v43 = vsub.f32 %v1336_v15, %v4318_v49  ;;  %v2260_v2 = vand.u32 4294901760, %v4326_v54  ;;  %v2040_v15 = vand.u32 4294901760, %v4337_v5 }
 0x264   :  { %2076 = vmatpush.msrb.mxu2 %v4235_v23  ;;  %2007 = vmatpush.msrb.mxu1 %v2006_v12  ;;  %v4374_v12 = vsub.f32 %v4793_v7, %v4340_v44  ;;  %v1337_v11 = vmul.f32 %v4798_v4, %v1330_v30  ;;  %v4390_v7 = vand.u32 4294901760, %v1353_v6  ;;  %v4407_v30 = vsub.f32 %v1369_v50, %v4376_v48 }
 0x265   :  { %2113 = vmatpush.msrb.mxu3 %v4251_v60  ;;  %2582 = vset.pattern.permute.xlu1 %v2682_v39  ;;  %v2046_v39 = vand.u32 4294901760, %v4358_v43  ;;  %v2041_v41 = vsub.f32 %v4337_v5, %v2040_v15  ;;  %v2256_v27 = vand.u32 4294901760, %v2255_v38 }
 0x266   :  { %1975 = vmatpush.msrb.mxu0 %v4275_v56  ;;  %2480 = vperm.xlu1 %2582, %v4786_v14   ;;  %v2034_v14 = vand.u32 4294901760, %v4323_v52  ;;  %v4409_v57 = vand.u32 4294901760, %v1337_v11  ;;  %v4422_v9 = vsub.f32 %v1353_v6, %v4390_v7 }
 0x267   :  { %2013 = vmatpush.msrb.mxu1 %v2012_v42  ;;  %2079 = vmatpush.msrb.mxu2 %v4291_v1  ;;  %v2266_v42 = vand.u32 4294901760, %v4344_v22  ;;  %v2047_v50 = vsub.f32 %v4358_v43, %v2046_v39  ;;  %v2042_v34 = vand.u32 4294901760, %v2041_v41  ;;  %v2586_v41 = vld [vmem:[#allocation5] sm:$0xff] }
 0x268   :  { %2115 = vmatpush.msrb.mxu3 %v4275_v56  ;;  %1977 = vmatpush.msrb.mxu0 %v4295_v18  ;;  %v2035_v21 = vsub.f32 %v4323_v52, %v2034_v14 }
 0x269   :  { %2019 = vmatpush.msrb.mxu1 %v2018_v55  ;;  %2082 = vmatpush.msrb.mxu2 %v4323_v52  ;;  %v2261_v55 = vsub.f32 %v4326_v54, %v2260_v2  ;;  %v2267_v47 = vsub.f32 %v4344_v22, %v2266_v42  ;;  %v2048_v26 = vand.u32 4294901760, %v2047_v50 }
 0x26a   :  { %2117 = vmatpush.msrb.mxu3 %v4295_v18  ;;  %1979 = vmatpush.msrb.mxu0 %v4318_v49 }
 0x26b   :  { %2025 = vmatpush.msrb.mxu1 %v2024_v37  ;;  %2085 = vmatpush.msrb.mxu2 %v4337_v5  ;;  %v4393_v37 = vsub.f32 %v1385_v28, %v4362_v36  ;;  %v2272_v28 = vand.u32 4294901760, %v4374_v12  ;;  %v2262_v4 = vand.u32 4294901760, %v2261_v55  ;;  %v2268_v6 = vand.u32 4294901760, %v2267_v47 }
 0x26c   :  { %2119 = vmatpush.msrb.mxu3 %v4318_v49  ;;  %1985 = vmatmul.f32.vlgmr.msrb.gmra.mxu0 %v4004_v17  ;;  %v2683_v55 = vmov 114  }
 0x26d   :  { %2123 = vmatmul.f32.vlgmr.msrb.gmra.mxu3 %v3941_v31  ;;  %2137 = vmatpush.msra.mxu0 %v1998_v8  ;;  %v2036_v8 = vand.u32 4294901760, %v2035_v21  ;;  %v2278_v38 = vand.u32 4294901760, %v4393_v37  ;;  %v2284_v21 = vand.u32 4294901760, %v4407_v30 }
 0x26e   :  { %2251 = vmatpush.msra.mxu3 %v2250_v46  ;;  %2031 = vmatpush.msrb.mxu1 %v2030_v0  ;;  %v4432_v46 = vsub.f32 %v1337_v11, %v4409_v57  ;;  %v2290_v11 = vand.u32 4294901760, %v4422_v9 }
 0x26f   :  { %2088 = vmatpush.msrb.mxu2 %v4358_v43  ;;  %2141 = vmatpush.msra.mxu0 %v2004_v10  ;;  %v2273_v10 = vsub.f32 %v4374_v12, %v2272_v28  ;;  %v2285_v58 = vsub.f32 %v4407_v30, %v2284_v21  ;;  %v4799_v43 = vld [vmem:[#allocation25_spill] sm:$0xff] }
 0x270   :  { %2091 = vmatmul.f32.vlgmr.msrb.gmra.mxu2 %v3912_v51  ;;  %2257 = vmatpush.msra.mxu3 %v2256_v27 }
 0x271   :  { %2213 = vmatpush.msra.mxu2 %v4247_v35  ;;  %2037 = vmatpush.msrb.mxu1 %v2036_v8  ;;  %v2274_v0 = vand.u32 4294901760, %v2273_v10  ;;  %v2286_v27 = vand.u32 4294901760, %v2285_v58 }
 0x272   :  { %2145 = vmatpush.msra.mxu0 %v2010_v3  ;;  %2263 = vmatpush.msra.mxu3 %v2262_v4  ;;  %v2279_v3 = vsub.f32 %v4393_v37, %v2278_v38 }
 0x273   :  { %2215 = vmatpush.msra.mxu2 %v4267_v61  ;;  %2043 = vmatpush.msrb.mxu1 %v2042_v34 }
 0x274   :  { %2149 = vmatpush.msra.mxu0 %v2016_v33  ;;  %2269 = vmatpush.msra.mxu3 %v2268_v6  ;;  %v2296_v33 = vand.u32 4294901760, %v4432_v46  ;;  %v2280_v23 = vand.u32 4294901760, %v2279_v3 }
 0x275   :  { %2217 = vmatpush.msra.mxu2 %v4283_v25  ;;  %2049 = vmatpush.msrb.mxu1 %v2048_v26 }
 0x276   :  { %2153 = vmatpush.msra.mxu0 %v2022_v20  ;;  %2051 = vmatmul.f32.vlgmr.msrb.gmra.mxu1 %v3887_v29  ;;  %v2291_v20 = vsub.f32 %v4422_v9, %v2290_v11 }
 0x277   :  { %2219 = vmatpush.msra.mxu2 %v4293_v53  ;;  %2183 = vmatpush.msra.mxu1 %v4156_v32  ;;  %v2297_v32 = vsub.f32 %v4432_v46, %v2296_v33 }
 0x278   :  { %2275 = vmatpush.msra.mxu3 %v2274_v0  ;;  %2580 = vset.pattern.permute.xlu2 %v2683_v55  ;;  %v2292_v1 = vand.u32 4294901760, %v2291_v20 }
 0x279   :  { %2157 = vmatpush.msra.mxu0 %v2028_v19  ;;  %2185 = vmatpush.msra.mxu1 %v4164_v13  ;;  %v2298_v13 = vand.u32 4294901760, %v2297_v32  ;;  %v4801_v32 = vld [vmem:[#allocation36_spill] sm:$0xff] }
 0x27a   :  { %2221 = vmatpush.msra.mxu2 %v4340_v44  ;;  %2281 = vmatpush.msra.mxu3 %v2280_v23 }
 0x27b   :  { %2456 = vperm.xlu2 %2580, %v2586_v41   ;;  %2161 = vmatpush.msra.mxu0 %v2034_v14 }
 0x27c   :  { %2187 = vmatpush.msra.mxu1 %v4171_v59  ;;  %2223 = vmatpush.msra.mxu2 %v4362_v36  ;;  %v2684_v59 = vmov 117  }
 0x27d   :  { %2287 = vmatpush.msra.mxu3 %v2286_v27  ;;  %2165 = vmatpush.msra.mxu0 %v2040_v15 }
 0x27e   :  { %2189 = vmatpush.msra.mxu1 %v4184_v40  ;;  %2225 = vmatpush.msra.mxu2 %v4376_v48  ;;  %v4536_v40 = vpop.f32.mrf.mxu2 }
 0x27f   :  { %2293 = vmatpush.msra.mxu3 %v2292_v1  ;;  %2169 = vmatpush.msra.mxu0 %v2046_v39 }
 0x280   :  { %2191 = vmatpush.msra.mxu1 %v4193_v24  ;;  %2227 = vmatpush.msra.mxu2 %v4390_v7 }
 0x281   :  { %2299 = vmatpush.msra.mxu3 %v2298_v13  ;;  %2171 = vmatmul.f32.vlgmr.msra.gmra.mxu0 %v3887_v29 }
 0x282   :  { %2301 = vmatmul.f32.vlgmr.msra.gmra.mxu3 %v3887_v29  ;;  %2314 = vmatpush.msrb.mxu0 %v4278_v62 }
 0x283   :  { %2433 = vmatpush.msrb.mxu3 %v4247_v35  ;;  %2193 = vmatpush.msra.mxu1 %v4251_v60 }
 0x284   :  { %2229 = vmatpush.msra.mxu2 %v4409_v57  ;;  %2317 = vmatpush.msrb.mxu0 %v4307_v63 }
 0x285   :  { %2235 = vmatmul.f32.vlgmr.msra.gmra.mxu2 %v4004_v17  ;;  %2435 = vmatpush.msrb.mxu3 %v4267_v61  ;;  %v4532_v17 = vpop.f32.mrf.mxu1 }
 0x286   :  { %2387 = vmatpush.msrb.mxu2 %v2248_v16  ;;  %2583 = vset.pattern.permute.xlu2 %v2684_v59 }
 0x287   :  { %2195 = vmatpush.msra.mxu1 %v4275_v56  ;;  %2488 = vperm.xlu2 %2583, %v2586_v41  }
 0x288   :  { %2320 = vmatpush.msrb.mxu0 %v4326_v54  ;;  %2391 = vmatpush.msrb.mxu2 %v2254_v45 }
 0x289   :  { %2437 = vmatpush.msrb.mxu3 %v4283_v25  ;;  %2197 = vmatpush.msra.mxu1 %v4295_v18 }
 0x28a   :  { %2323 = vmatpush.msrb.mxu0 %v4344_v22  ;;  %2395 = vmatpush.msrb.mxu2 %v2260_v2 }
 0x28b   :  { %2439 = vmatpush.msrb.mxu3 %v4293_v53  ;;  %2199 = vmatpush.msra.mxu1 %v4318_v49 }
 0x28c   :  { %2326 = vmatpush.msrb.mxu0 %v4374_v12  ;;  %2201 = vmatmul.f32.vlgmr.msra.gmra.mxu1 %v3887_v29 }
 0x28d   :  { %2399 = vmatpush.msrb.mxu2 %v2266_v42  ;;  %2353 = vmatpush.msrb.mxu1 %v4247_v35  ;;  %v4538_v35 = vpop.f32.mrf.mxu3 }
 0x28e   :  { %2441 = vmatpush.msrb.mxu3 %v4340_v44  ;;  %2329 = vmatpush.msrb.mxu0 %v4393_v37 }
 0x28f   :  { %2403 = vmatpush.msrb.mxu2 %v2272_v28  ;;  %2355 = vmatpush.msrb.mxu1 %v4267_v61 }
 0x290   :  { %2443 = vmatpush.msrb.mxu3 %v4362_v36  ;;  %2332 = vmatpush.msrb.mxu0 %v4407_v30 }
 0x291   :  { %2407 = vmatpush.msrb.mxu2 %v2278_v38  ;;  %2357 = vmatpush.msrb.mxu1 %v4283_v25 }
 0x292   :  { %2445 = vmatpush.msrb.mxu3 %v4376_v48  ;;  %2335 = vmatpush.msrb.mxu0 %v4422_v9  ;;  %v4800_v9 = vld [vmem:[#allocation21_spill] sm:$0xff] }
 0x293   :  { %2411 = vmatpush.msrb.mxu2 %v2284_v21  ;;  %2359 = vmatpush.msrb.mxu1 %v4293_v53 }
 0x294   :  { %2447 = vmatpush.msrb.mxu3 %v4390_v7  ;;  %2338 = vmatpush.msrb.mxu0 %v4432_v46 }
 0x295   :  { %2415 = vmatpush.msrb.mxu2 %v2290_v11  ;;  %2361 = vmatpush.msrb.mxu1 %v4340_v44 }
 0x296   :  { %2449 = vmatpush.msrb.mxu3 %v4409_v57  ;;  %2341 = vmatmul.f32.vlgmr.msrb.gmra.mxu0 %v3912_v51  ;;  %v4534_v51 = vpop.f32.mrf.mxu0 }
 0x297   :  { %2451 = vmatmul.f32.vlgmr.msrb.gmra.mxu3 %v3887_v29  ;;  %2363 = vmatpush.msrb.mxu1 %v4362_v36 }
 0x298   :  { %2419 = vmatpush.msrb.mxu2 %v2296_v33  ;;  %2584 = vset.pattern.permute.xlu0 %v2684_v59 }
 0x299   :  { %2421 = vmatmul.f32.vlgmr.msrb.gmra.mxu2 %v3887_v29  ;;  %2365 = vmatpush.msrb.mxu1 %v4376_v48 }
 0x29b   :  { %2367 = vmatpush.msrb.mxu1 %v4390_v7 }
 0x29d   :  { %2369 = vmatpush.msrb.mxu1 %v4409_v57 }
 0x29e   :  { %2373 = vmatmul.f32.vlgmr.msrb.gmra.mxu1 %v3941_v31 }
 0x2ac   :  { %v1486_v60 = vpop.f32.mrf.mxu0 }
 0x2b3   :  { %v1624_v62 = vpop.f32.mrf.mxu3 }
 0x2b5   :  { %v1552_v24 = vpop.f32.mrf.mxu1  ;;  %v1592_v61 = vpop.f32.mrf.mxu2 }
 0x2b6   :  { %v1553_v29 = vadd.f32 %v1552_v24, %v1486_v60 }
 0x2b8   :  { %v1593_v56 = vadd.f32 %v1592_v61, %v1553_v29 }
 0x2ba   :  { %v1625_v53 = vadd.f32 %v1624_v62, %v1593_v56 }
 0x2bf   :  { %v1672_v25 = vpop.f32.mrf.mxu0 }
 0x2c0   :  { %v1673_v63 = vadd.f32 %v1672_v25, %v1625_v53 }
 0x2c6   :  { %v1802_v44 = vpop.f32.mrf.mxu3 }
 0x2c9   :  { %v1702_v18 = vpop.f32.mrf.mxu1  ;;  %v1736_v19 = vpop.f32.mrf.mxu2 }
 0x2ca   :  { %v1703_v16 = vadd.f32 %v1702_v18, %v1673_v63  ;;  %v1803_v45 = vadd.f32 %v1802_v44, %v1736_v19  ;;  %v4802_v63 = vld [vmem:[#allocation37_spill] sm:$0xff] }
 0x2d0   :  { %v4542_v49 = vpop.permute.xlu0 %2464 }
 0x2d3   :  { %v1842_v22 = vpop.f32.mrf.mxu0 }
 0x2d4   :  { %v1843_v2 = vadd.f32 %v1842_v22, %v1803_v45 }
 0x2d5   :  { %v4540_v31 = vpop.permute.xlu2 %2456 }
 0x2d6   :  { %v2459_v52 = vmul.f32 %v4540_v31, %v1703_v16  ;;  %v1196_v16 = vadd.f32 %v4534_v51, %v4802_v63 }
 0x2d8   :  { %v2467_v54 = vadd.f32 %v4542_v49, %v2459_v52  ;;  %v2481_v36 = vpop.permute.xlu1 %2480  ;;  %v1230_v19 = vadd.f32 %v4532_v17, %v1196_v16 }
 0x2da   :  { %v2471_v5 = vmax.f32 %v2467_v54, 0.0  ;;  %v1952_v28 = vpop.f32.mrf.mxu3  ;;  %v1270_v22 = vadd.f32 %v4536_v40, %v1230_v19 }
 0x2dc   :  { %v2475_v14 = vadd.f32 %v2471_v5, %v4799_v43  ;;  %v1300_v43 = vadd.f32 %v4538_v35, %v1270_v22 }
 0x2dd   :  { %v1922_v42 = vpop.f32.mrf.mxu2 }
 0x2de   :  { %v2483_v15 = vmul.f32 %v2481_v36, %v2475_v14  ;;  %v1874_v12 = vpop.f32.mrf.mxu1 }
 0x2df   :  { %v1875_v48 = vadd.f32 %v1874_v12, %v1843_v2 }
 0x2e1   :  { %v2489_v39 = vpop.permute.xlu2 %2488  ;;  %v1923_v7 = vadd.f32 %v1922_v42, %v1875_v48 }
 0x2e2   :  { %v2491_v37 = vadd.f32 %v2489_v39, %v2483_v15 }
 0x2e3   :  { %v1953_v30 = vadd.f32 %v1952_v28, %v1923_v7 }
 0x2e4   :  { %v2495_v57 = vmax.f32 %v2491_v37, 0.0 }
 0x2e5   :  { %v2460_v47 = vmul.f32 %v4540_v31, %v1953_v30 }
 0x2e6   :  { %2499 = vst [vmem:[#allocation7] sm:$0xff] %v2495_v57 }
 0x2e7   :  { %v2468_v8 = vadd.f32 %v4542_v49, %v2460_v47 }
 0x2e9   :  { %v2472_v50 = vmax.f32 %v2468_v8, 0.0  ;;  %v1986_v6 = vpop.f32.mrf.mxu0 }
 0x2eb   :  { %v2476_v4 = vadd.f32 %v2472_v50, %v4800_v9 }
 0x2ed   :  { %v2484_v38 = vmul.f32 %v2481_v36, %v2476_v4 }
 0x2ef   :  { %v2492_v34 = vadd.f32 %v2489_v39, %v2484_v38 }
 0x2f0   :  { %v2124_v11 = vpop.f32.mrf.mxu3 }
 0x2f1   :  { %v2496_v10 = vmax.f32 %v2492_v34, 0.0 }
 0x2f3   :  { %2500 = vst [vmem:[#allocation7 + $0x8] sm:$0xff] %v2496_v10  ;;  %v2052_v46 = vpop.f32.mrf.mxu1  ;;  %v2092_v26 = vpop.f32.mrf.mxu2 }
 0x2f4   :  { %v2053_v21 = vadd.f32 %v2052_v46, %v1986_v6 }
 0x2f6   :  { %v2093_v3 = vadd.f32 %v2092_v26, %v2053_v21 }
 0x2f8   :  { %v2125_v58 = vadd.f32 %v2124_v11, %v2093_v3 }
 0x2fe   :  { %v2172_v0 = vpop.f32.mrf.mxu0 }
 0x2ff   :  { %v2173_v33 = vadd.f32 %v2172_v0, %v2125_v58 }
 0x305   :  { %v2302_v60 = vpop.f32.mrf.mxu3 }
 0x308   :  { %v2236_v59 = vpop.f32.mrf.mxu2 }
 0x309   :  { %v2202_v55 = vpop.f32.mrf.mxu1  ;;  %v2303_v56 = vadd.f32 %v2302_v60, %v2236_v59 }
 0x30a   :  { %v2203_v23 = vadd.f32 %v2202_v55, %v2173_v33 }
 0x30c   :  { %v2461_v20 = vmul.f32 %v4540_v31, %v2203_v23 }
 0x30e   :  { %v2469_v41 = vadd.f32 %v4542_v49, %v2461_v20 }
 0x310   :  { %v2473_v27 = vmax.f32 %v2469_v41, 0.0 }
 0x312   :  { %v2477_v1 = vadd.f32 %v2473_v27, %v4801_v32 }
 0x313   :  { %v2342_v29 = vpop.f32.mrf.mxu0 }
 0x314   :  { %v2485_v13 = vmul.f32 %v2481_v36, %v2477_v1  ;;  %v2343_v62 = vadd.f32 %v2342_v29, %v2303_v56 }
 0x316   :  { %v2493_v24 = vadd.f32 %v2489_v39, %v2485_v13 }
 0x318   :  { %v2497_v61 = vmax.f32 %v2493_v24, 0.0 }
 0x31a   :  { %2502 = vst [vmem:[#allocation7 + $0x10] sm:$0xff] %v2497_v61  ;;  %v2452_v54 = vpop.f32.mrf.mxu3 }
 0x31b   :  { %v2374_v25 = vpop.f32.mrf.mxu1 }
 0x31c   :  { %v2375_v53 = vadd.f32 %v2374_v25, %v2343_v62  ;;  %v2422_v18 = vpop.f32.mrf.mxu2 }
 0x31e   :  { %v2423_v52 = vadd.f32 %v2422_v18, %v2375_v53 }
 0x320   :  { %v2453_v5 = vadd.f32 %v2452_v54, %v2423_v52 }
 0x322   :  { %v2462_v44 = vmul.f32 %v4540_v31, %v2453_v5 }
 0x324   :  { %v2470_v45 = vadd.f32 %v4542_v49, %v2462_v44 }
 0x326   :  { %v2474_v14 = vmax.f32 %v2470_v45, 0.0 }
 0x328   :  { %v2478_v2 = vadd.f32 %v2474_v14, %v1300_v43 }
 0x32a   :  { %v2486_v15 = vmul.f32 %v2481_v36, %v2478_v2 }
 0x32c   :  { %v2494_v51 = vadd.f32 %v2489_v39, %v2486_v15 }
 0x32e   :  { %v2498_v17 = vmax.f32 %v2494_v51, 0.0 }
 0x330   :  { %2503 = vst [vmem:[#allocation7 + $0x18] sm:$0xff] %v2498_v17 }
 0x331   :  { %2516 = dma.vmem_to_hbm [thread:$0]  %s2509_s29, 512, %s2511_s4, [#allocation4], %s2686_s5, %s2686_s5, %s2674_s24  }
 0x332   :  { %2663 = dma.done.wait [#allocation4], 512  }
 0x333   :  { %2664 = vsyncadd [#allocation4], 4294966784 }
 0x334   :  { %2521 = vsyncpa [#allocation3], 1 }
 0x335   :  { %2522 = vsyncpa [#allocation6], 1 }
 0x336   :  { %2523 = vsyncpa [#allocation4], 1 }

</bundles_post_ra>
